<compile_context>
chip_gen: v7x
topology: tpu7x:2x2x1
jax: 0.10.0
libtpu: 0.0.40
codegen_flags: <defaults>
</compile_context>

<pallas_src>
import math

import numpy as np
import jax
import jax.numpy as jnp
from jax import lax
from jax.experimental import pallas as pl
from jax.experimental.pallas import tpu as pltpu

# ---------------------------------------------------------------------------
# Small, deterministic config consistent with the module's constructor.
# ---------------------------------------------------------------------------
BATCH        = 2
SEQ_LEN      = 8
EMBED_DIM    = 32
HEAD_DIM     = 8
NUM_Q_HEADS  = 4
NUM_KV_HEADS = 2
WINDOW_SIZE  = 4
DROPOUT      = 0.0      # forward pass in eval mode -> dropout is identity
PROJ_FACTOR  = 2
NUM_BLOCKS   = 2

BS  = BATCH * SEQ_LEN            # folded (batch * seq) rows = 16
QKD = NUM_Q_HEADS * HEAD_DIM     # full query-head width = 32
QK2 = 2 * QKD                    # [q|k] slab width = HQ*BS = S*SO = 64
HID = PROJ_FACTOR * EMBED_DIM    # MLP hidden = 64
SO  = SEQ_LEN                    # out_layer output features = 8


# ---------------------------------------------------------------------------
# Shared math helpers (traced both inside the Pallas kernel and in the JAX ref)
# ---------------------------------------------------------------------------
def _layer_norm(h, w, b, eps=1e-5):
    mu = jnp.mean(h, axis=-1, keepdims=True)
    xc = h - mu
    var = jnp.mean(xc * xc, axis=-1, keepdims=True)
    return xc * lax.rsqrt(var + eps) * w + b


def _gelu_tanh(x):
    # TODO(synk): PyTorch nn.GELU defaults to exact erf; tanh approximation used here.
    c = math.sqrt(2.0 / math.pi)
    return 0.5 * x * (1.0 + jnp.tanh(c * (x + 0.044715 * x * x * x)))


def _rope(x, cos, sin):
    # GPT-NeoX style rotate-half RoPE on an (S, D) slab (reference only).
    d = x.shape[-1]
    x1 = x[:, : d // 2]
    x2 = x[:, d // 2:]
    rot = jnp.concatenate([-x2, x1], axis=-1)
    return x * cos + rot * sin


# ---------------------------------------------------------------------------
# Pallas kernel: whole forward pass, all operands resident in VMEM (tiny shapes,
# so every input is a full-array VMEM block and there is no grid).
# ---------------------------------------------------------------------------
def _model_kernel(x_ref, consts_ref, tab_ref, m64_ref, wblk_ref, o_ref):
    E, D, HQ = EMBED_DIM, HEAD_DIM, NUM_Q_HEADS
    scale = 1.0 / math.sqrt(D)

    # ---- packed tables (static lane offsets; loaded once, reused by both blocks) ----
    cos64 = tab_ref[:, 0:QK2]                   # (BS, 64) RoPE cos for the [q | k] slab
    sin64 = tab_ref[:, QK2:2 * QK2]             # (BS, 64)
    amask = tab_ref[:, 2 * QK2:3 * QK2]         # (BS, HQ*BS) additive window mask
    dmask = tab_ref[:, 3 * QK2:4 * QK2]         # (BS, S*SO) out-layer select mask

    rot64   = m64_ref[:, 0:QK2]                 # (64, 64) rotate-half signed perm (q|k)
    hmask_v = m64_ref[:, QK2:QK2 + QKD]         # (64, 32) head block-diag mask (V side)
    sel     = m64_ref[0:8, 96:112]              # (8, BS) batch row-sum (rows >= B zero)
    rfold   = m64_ref[:, 128:256]               # (64, 128) lane fold, zero padded
    hmask_k = m64_ref[0:QKD, 256:320]           # (32, 64) head block-diag mask (K side)
    wcat    = m64_ref[QKD:2 * QKD, 256:320]     # (32, 64) out-layer weight

    g = NUM_BLOCKS * 3
    lin_w = consts_ref[g:g + 1, 0:E]
    lin_b = consts_ref[g:g + 1, E:2 * E]
    lnf_w = consts_ref[g:g + 1, 2 * E:3 * E]
    lnf_b = consts_ref[g:g + 1, 3 * E:4 * E]
    outb  = consts_ref[g + 1:g + 2, :]          # (1, 128); lanes >= SO are zero

    # ---- lin: Linear(1, embed) on x.unsqueeze(-1), all (b, s) rows at once ----
    h = x_ref[...] * lin_w + lin_b              # (BS,1)*(1,E)+(1,E) -> (BS,E)

    for blk in range(NUM_BLOCKS):
        base = blk * 3
        ln1_w = consts_ref[base:base + 1, 0:E]
        ln1_b = consts_ref[base:base + 1, E:2 * E]
        ln2_w = consts_ref[base:base + 1, 2 * E:3 * E]
        ln2_b = consts_ref[base:base + 1, 3 * E:4 * E]
        bqkv  = consts_ref[base + 1:base + 2, 0:3 * QKD]
        bo    = consts_ref[base + 1:base + 2, 3 * QKD:3 * QKD + E]
        b1    = consts_ref[base + 2:base + 3, 0:HID]
        b2    = consts_ref[base + 2:base + 3, HID:HID + E]

        wqkv = wblk_ref[blk, :, 0:3 * QKD]                        # (32, 96)
        wo   = wblk_ref[blk, :, 3 * QKD:3 * QKD + E]              # (32, 32)
        w1   = wblk_ref[blk, :, 3 * QKD + E:3 * QKD + E + HID]    # (32, 64)
        w2   = m64_ref[:, 320 + blk * E:320 + (blk + 1) * E]      # (64, 32)

        # ---- RoPE GQA attention: all heads fused via block-diagonal matmuls ----
        a = _layer_norm(h, ln1_w, ln1_b)
        qkv = jnp.dot(a, wqkv, preferred_element_type=jnp.float32) + bqkv   # (BS, 96)

        # fused rotate-half RoPE on q and k simultaneously (one matmul, 64-lane FMAs)
        qk = qkv[:, 0:QK2]
        qk = qk * cos64 + jnp.dot(qk, rot64,
                                  preferred_element_type=jnp.float32) * sin64
        q = qk[:, 0:QKD]
        k = qk[:, QKD:QK2]
        v = qkv[:, QK2:3 * QKD]

        # block-diagonal K^T: ONE full transpose + lane replicate + 0/1 head mask
        kt  = k.T                                                   # (QKD, BS)
        kbd = jnp.concatenate([kt] * HQ, axis=1) * hmask_k          # (QKD, HQ*BS)
        s = jnp.dot(q, kbd, preferred_element_type=jnp.float32) * scale + amask

        # softmax with a single global row-max (safe: every head row has a live key)
        m = jnp.max(s, axis=-1, keepdims=True)
        e = jnp.exp(s - m)                                          # (BS, HQ*BS)
        vbd   = jnp.concatenate([v] * HQ, axis=0) * hmask_v         # (HQ*BS, QKD)
        denom = jnp.dot(e, hmask_v, preferred_element_type=jnp.float32)  # (BS, QKD)
        o_un  = jnp.dot(e, vbd, preferred_element_type=jnp.float32)      # (BS, QKD)
        attn  = o_un / denom                # exact reciprocal (tighter softmax parity)

        h = h + jnp.dot(attn, wo, preferred_element_type=jnp.float32) + bo

        # ---- GELU MLP (pre-LN, residual); dropout == identity ----
        mh = _layer_norm(h, ln2_w, ln2_b)
        mh = _gelu_tanh(jnp.dot(mh, w1, preferred_element_type=jnp.float32) + b1)
        h = h + jnp.dot(mh, w2, preferred_element_type=jnp.float32) + b2

    # ---- final LayerNorm ----
    h = _layer_norm(h, lnf_w, lnf_b)

    # ---- out_layer on flatten(x, -2, -1): 3 matmuls + selection mask, no reshape ----
    # z[r, s*SO+t] = h[r] @ outw[s][:, t]; dmask keeps s == (r mod S); sel sums the S
    # rows of each batch element; rfold folds the S lane-groups (zero-padded to 128
    # lanes so the final store is a full-tile unmasked vst).
    z = jnp.dot(h, wcat, preferred_element_type=jnp.float32) * dmask     # (BS, S*SO)
    y = jnp.dot(sel, z, preferred_element_type=jnp.float32)              # (8, S*SO)
    out = jnp.dot(y, rfold, preferred_element_type=jnp.float32) + outb   # (8, 128)
    o_ref[...] = out


# ---------------------------------------------------------------------------
# Parameter setup (unpacked, torch-like layout) — shared by kernel packing & reference
# ---------------------------------------------------------------------------
def init_params(key):
    S, E, D = SEQ_LEN, EMBED_DIM, HEAD_DIM
    HQ, HKV, NB, PF = NUM_Q_HEADS, NUM_KV_HEADS, NUM_BLOCKS, PROJ_FACTOR
    keys = jax.random.split(key, 16)

    def rnd(k, shape, scl=0.05):
        return jax.random.normal(k, shape, jnp.float32) * scl

    p = {}
    p["lin_w"] = rnd(keys[0], (1, E))          # Linear(1, E) weight, transposed
    p["lin_b"] = rnd(keys[1], (1, E))
    p["ln1_w"] = jnp.ones((NB, 1, E), jnp.float32)
    p["ln1_b"] = jnp.zeros((NB, 1, E), jnp.float32)
    p["wq"] = rnd(keys[2], (NB, E, HQ * D))
    p["bq"] = rnd(keys[3], (NB, 1, HQ * D))
    p["wk"] = rnd(keys[4], (NB, E, HKV * D))
    p["bk"] = rnd(keys[5], (NB, 1, HKV * D))
    p["wv"] = rnd(keys[6], (NB, E, HKV * D))
    p["bv"] = rnd(keys[7], (NB, 1, HKV * D))
    p["wo"] = rnd(keys[8], (NB, HQ * D, E))
    p["bo"] = rnd(keys[9], (NB, 1, E))
    p["ln2_w"] = jnp.ones((NB, 1, E), jnp.float32)
    p["ln2_b"] = jnp.zeros((NB, 1, E), jnp.float32)
    p["w1"] = rnd(keys[10], (NB, E, PF * E))
    p["b1"] = rnd(keys[11], (NB, 1, PF * E))
    p["w2"] = rnd(keys[12], (NB, PF * E, E))
    p["b2"] = rnd(keys[13], (NB, 1, E))
    p["lnf_w"] = jnp.ones((1, E), jnp.float32)
    p["lnf_b"] = jnp.zeros((1, E), jnp.float32)
    p["outw"] = rnd(keys[14], (S, E, S))       # Linear(S*E, S) weight.T as (S, E, S)
    p["outb"] = rnd(keys[15], (1, S))
    # RoPE tables (rotate-half convention), per-head (S, D)
    inv_freq = 1.0 / (10000.0 ** (jnp.arange(0, D, 2, dtype=jnp.float32) / D))
    ang = jnp.arange(S, dtype=jnp.float32)[:, None] * inv_freq[None, :]
    p["cos"] = jnp.concatenate([jnp.cos(ang), jnp.cos(ang)], axis=-1)
    p["sin"] = jnp.concatenate([jnp.sin(ang), jnp.sin(ang)], axis=-1)
    return p


def pack_params(p):
    """Pack the torch-layout params into 4 lane-dense slabs (wrapper-side glue)."""
    S, E, D = SEQ_LEN, EMBED_DIM, HEAD_DIM
    HQ, HKV, NB = NUM_Q_HEADS, NUM_KV_HEADS, NUM_BLOCKS
    rep = HQ // HKV
    f32 = jnp.float32

    def expand_kv(w):
        # (..., HKV*D) -> (..., HQ*D); query head hq reads kv head hq // rep.
        parts = [w[..., h * D:(h + 1) * D] for h in range(HKV) for _ in range(rep)]
        return jnp.concatenate(parts, axis=-1)

    # fused q/k/v projection with the GQA repeat folded into the weights/biases
    wqkv = jnp.concatenate([p["wq"], expand_kv(p["wk"]), expand_kv(p["wv"])],
                           axis=-1)                                   # (NB, E, 3*HQ*D)
    bqkv = jnp.concatenate([p["bq"], expand_kv(p["bk"]), expand_kv(p["bv"])],
                           axis=-1)                                   # (NB, 1, 3*HQ*D)

    # ---- consts (8, 128): all biases / LN params, 3 rows per block ----
    def row(*parts):
        r = jnp.concatenate([jnp.ravel(q) for q in parts]).astype(f32)
        return jnp.pad(r, (0, 128 - r.shape[0]))

    rows = []
    for blk in range(NB):
        rows.append(row(p["ln1_w"][blk], p["ln1_b"][blk],
                        p["ln2_w"][blk], p["ln2_b"][blk]))
        rows.append(row(bqkv[blk], p["bo"][blk]))
        rows.append(row(p["b1"][blk], p["b2"][blk]))
    rows.append(row(p["lin_w"], p["lin_b"], p["lnf_w"], p["lnf_b"]))
    rows.append(row(p["outb"]))
    consts = jnp.stack(rows)                                          # (8, 128)

    # ---- tab16 (16, 256): RoPE cos|sin for [q|k], window mask, out-layer select ----
    cos_q = jnp.tile(p["cos"], (BATCH, HQ))                           # (BS, QKD)
    sin_q = jnp.tile(p["sin"], (BATCH, HQ))
    cos64 = jnp.concatenate([cos_q, cos_q], axis=1)                   # (BS, 2*QKD)
    sin64 = jnp.concatenate([sin_q, sin_q], axis=1)

    rr = np.arange(BS)
    same_b = (rr[:, None] // S) == (rr[None, :] // S)
    caus = (rr[None, :] <= rr[:, None]) & ((rr[:, None] - rr[None, :]) < WINDOW_SIZE)
    amask = np.where(same_b & caus, 0.0, -1e30).astype(np.float32)    # (BS, BS)
    amask64 = np.tile(amask, (1, HQ))                                 # (BS, HQ*BS)

    r_idx = np.arange(BS)[:, None]
    l_idx = np.arange(S * SO)[None, :]
    dmask = ((r_idx % S) == (l_idx // SO)).astype(np.float32)         # (BS, S*SO)

    tab16 = jnp.concatenate([cos64, sin64, jnp.asarray(amask64),
                             jnp.asarray(dmask)], axis=1)             # (16, 256)

    # ---- m64 (64, 384): rotation perm, head masks, out-layer glue, per-block w2 ----
    rot32 = np.zeros((QKD, QKD), np.float32)
    for hh in range(HQ):
        for d in range(D // 2):
            rot32[hh * D + d + D // 2, hh * D + d] = -1.0
            rot32[hh * D + d, hh * D + d + D // 2] = 1.0
    rot64 = np.zeros((QK2, QK2), np.float32)
    rot64[:QKD, :QKD] = rot32
    rot64[QKD:, QKD:] = rot32

    hmask_v = np.kron(np.eye(HQ, dtype=np.float32),
                      np.ones((BS, D), np.float32))                   # (HQ*BS, QKD)
    hmask_k = np.ascontiguousarray(hmask_v.T)                         # (QKD, HQ*BS)

    sel_col = np.zeros((QK2, BS), np.float32)                         # (64, 16)
    sel_col[:BATCH] = np.kron(np.eye(BATCH, dtype=np.float32),
                              np.ones((1, S), np.float32))

    rfold = np.zeros((S * SO, 128), np.float32)                       # zero-padded lanes
    rfold[:, :SO] = np.tile(np.eye(SO, dtype=np.float32), (S, 1))

    wcat = jnp.transpose(p["outw"], (1, 0, 2)).reshape(E, S * SO)     # (32, 64)
    kw_col = jnp.concatenate([jnp.asarray(hmask_k), wcat], axis=0)    # (64, 64)
    w2cat = jnp.concatenate([p["w2"][b] for b in range(NB)], axis=1)  # (64, NB*E)

    m64 = jnp.concatenate([
        jnp.asarray(rot64),                    # lanes   0: 64
        jnp.asarray(hmask_v),                  # lanes  64: 96
        jnp.asarray(sel_col),                  # lanes  96:112
        jnp.zeros((QK2, 16), f32),             # lanes 112:128 (pad)
        jnp.asarray(rfold),                    # lanes 128:256
        kw_col,                                # lanes 256:320 (hmask_k rows 0:32, wcat rows 32:64)
        w2cat,                                 # lanes 320:384
    ], axis=1)                                 # (64, 384)

    # per-block 32-row weights lane-concatenated: [wqkv | wo | w1]
    wblk = jnp.concatenate([wqkv, p["wo"], p["w1"]], axis=-1)         # (NB, 32, 192)

    return dict(consts=consts, tab16=tab16, m64=m64, wblk=wblk)


@jax.jit
def timeseries_forward(x, packed):
    x2 = x.reshape(BS, 1).astype(jnp.float32)        # (B,S) -> folded (B*S, 1)
    args = (x2, packed["consts"], packed["tab16"], packed["m64"], packed["wblk"])
    vmem = pl.BlockSpec(memory_space=pltpu.MemorySpace.VMEM)
    out = pl.pallas_call(
        _model_kernel,
        out_shape=jax.ShapeDtypeStruct((8, 128), jnp.float32),   # lane-dense padded
        in_specs=[vmem] * len(args),
        out_specs=vmem,
    )(*args)
    return out[:BATCH, :SEQ_LEN]


# ---------------------------------------------------------------------------
# Pure-JAX reference (same math, unpacked params) — in-script correctness check.
# ---------------------------------------------------------------------------
def forward_ref(x, p):
    B, S = x.shape
    D = HEAD_DIM
    rep = NUM_Q_HEADS // NUM_KV_HEADS
    scale = 1.0 / math.sqrt(D)
    i_idx = jnp.arange(S)[:, None]
    j_idx = jnp.arange(S)[None, :]
    mask = (j_idx <= i_idx) & ((i_idx - j_idx) < WINDOW_SIZE)
    cos, sin = p["cos"], p["sin"]
    outs = []
    for b in range(B):
        xb = x[b][:, None]
        h = xb * p["lin_w"] + p["lin_b"]
        for blk in range(NUM_BLOCKS):
            a = _layer_norm(h, p["ln1_w"][blk], p["ln1_b"][blk])
            q = a @ p["wq"][blk] + p["bq"][blk]
            k = a @ p["wk"][blk] + p["bk"][blk]
            v = a @ p["wv"][blk] + p["bv"][blk]
            attn = jnp.zeros((S, EMBED_DIM), jnp.float32)
            for hq in range(NUM_Q_HEADS):
                kvh = hq // rep
                q_h = _rope(q[:, hq * D:(hq + 1) * D], cos, sin)
                k_h = _rope(k[:, kvh * D:(kvh + 1) * D], cos, sin)
                v_h = v[:, kvh * D:(kvh + 1) * D]
                s = (q_h @ k_h.T) * scale
                s = jnp.where(mask, s, -1e30)
                pm = jax.nn.softmax(s, axis=-1)
                attn = attn + (pm @ v_h) @ p["wo"][blk][hq * D:(hq + 1) * D, :]
            h = h + attn + p["bo"][blk]
            mh = _layer_norm(h, p["ln2_w"][blk], p["ln2_b"][blk])
            mh = _gelu_tanh(mh @ p["w1"][blk] + p["b1"][blk])
            mh = mh @ p["w2"][blk] + p["b2"][blk]
            h = h + mh
        h = _layer_norm(h, p["lnf_w"], p["lnf_b"])
        flat = h.reshape(1, S * EMBED_DIM)
        o = flat @ p["outw"].reshape(S * EMBED_DIM, S) + p["outb"]
        outs.append(o[0])
    return jnp.stack(outs)


if __name__ == "__main__":
    key = jax.random.PRNGKey(0)
    kx, kp = jax.random.split(key)
    x = jax.random.normal(kx, (BATCH, SEQ_LEN), jnp.float32)
    params = init_params(kp)
    packed = pack_params(params)

    y = timeseries_forward(x, packed)
    y = jax.block_until_ready(y)

    y_ref = forward_ref(x, params)
    assert y.shape == (BATCH, SEQ_LEN), y.shape
    # softmax reciprocal is exact now; tolerance covers matmul pass-precision
    # differences between the Pallas MXU dots and the XLA reference dots.
    assert jnp.allclose(y, y_ref, atol=1e-2, rtol=1e-2), (y, y_ref)
    print("KERNEL_OK")
</pallas_src>

<mosaic_0001>
module attributes {stable_mosaic.version = 11 : i64} {
  func.func @_model_kernel(%arg0: memref<16x1xf32, #tpu.memory_space<vmem>>, %arg1: memref<8x128xf32, #tpu.memory_space<vmem>>, %arg2: memref<16x256xf32, #tpu.memory_space<vmem>>, %arg3: memref<64x384xf32, #tpu.memory_space<vmem>>, %arg4: memref<2x32x192xf32, #tpu.memory_space<vmem>>, %arg5: memref<8x128xf32, #tpu.memory_space<vmem>>) attributes {dimension_semantics = [], scalar_prefetch = 0 : i64, scratch_operands = 0 : i64, tpu.core_type = #tpu.core_type<tc>} {
    %c0 = arith.constant 0 : index
    %c0_0 = arith.constant 0 : index
    %0 = vector.load %arg2[%c0, %c0_0] : memref<16x256xf32, #tpu.memory_space<vmem>>, vector<16x64xf32>
    %c0_1 = arith.constant 0 : index
    %c64 = arith.constant 64 : index
    %1 = vector.load %arg2[%c0_1, %c64] : memref<16x256xf32, #tpu.memory_space<vmem>>, vector<16x64xf32>
    %c0_2 = arith.constant 0 : index
    %c128 = arith.constant 128 : index
    %2 = vector.load %arg2[%c0_2, %c128] : memref<16x256xf32, #tpu.memory_space<vmem>>, vector<16x64xf32>
    %c0_3 = arith.constant 0 : index
    %c192 = arith.constant 192 : index
    %3 = vector.load %arg2[%c0_3, %c192] : memref<16x256xf32, #tpu.memory_space<vmem>>, vector<16x64xf32>
    %c0_4 = arith.constant 0 : index
    %c0_5 = arith.constant 0 : index
    %4 = vector.load %arg3[%c0_4, %c0_5] : memref<64x384xf32, #tpu.memory_space<vmem>>, vector<64x64xf32>
    %c0_6 = arith.constant 0 : index
    %c64_7 = arith.constant 64 : index
    %5 = vector.load %arg3[%c0_6, %c64_7] : memref<64x384xf32, #tpu.memory_space<vmem>>, vector<64x32xf32>
    %c0_8 = arith.constant 0 : index
    %c96 = arith.constant 96 : index
    %6 = vector.load %arg3[%c0_8, %c96] : memref<64x384xf32, #tpu.memory_space<vmem>>, vector<8x16xf32>
    %c0_9 = arith.constant 0 : index
    %c128_10 = arith.constant 128 : index
    %7 = vector.load %arg3[%c0_9, %c128_10] : memref<64x384xf32, #tpu.memory_space<vmem>>, vector<64x128xf32>
    %c0_11 = arith.constant 0 : index
    %c256 = arith.constant 256 : index
    %8 = vector.load %arg3[%c0_11, %c256] : memref<64x384xf32, #tpu.memory_space<vmem>>, vector<32x64xf32>
    %c32 = arith.constant 32 : index
    %c256_12 = arith.constant 256 : index
    %9 = vector.load %arg3[%c32, %c256_12] : memref<64x384xf32, #tpu.memory_space<vmem>>, vector<32x64xf32>
    %c6 = arith.constant 6 : index
    %c0_13 = arith.constant 0 : index
    %10 = vector.load %arg1[%c6, %c0_13] : memref<8x128xf32, #tpu.memory_space<vmem>>, vector<1x32xf32>
    %c6_14 = arith.constant 6 : index
    %c32_15 = arith.constant 32 : index
    %11 = vector.load %arg1[%c6_14, %c32_15] : memref<8x128xf32, #tpu.memory_space<vmem>>, vector<1x32xf32>
    %c6_16 = arith.constant 6 : index
    %c64_17 = arith.constant 64 : index
    %12 = vector.load %arg1[%c6_16, %c64_17] : memref<8x128xf32, #tpu.memory_space<vmem>>, vector<1x32xf32>
    %c6_18 = arith.constant 6 : index
    %c96_19 = arith.constant 96 : index
    %13 = vector.load %arg1[%c6_18, %c96_19] : memref<8x128xf32, #tpu.memory_space<vmem>>, vector<1x32xf32>
    %c7 = arith.constant 7 : index
    %c0_20 = arith.constant 0 : index
    %14 = vector.load %arg1[%c7, %c0_20] : memref<8x128xf32, #tpu.memory_space<vmem>>, vector<1x128xf32>
    %c0_21 = arith.constant 0 : index
    %c0_22 = arith.constant 0 : index
    %15 = vector.load %arg0[%c0_21, %c0_22] : memref<16x1xf32, #tpu.memory_space<vmem>>, vector<16x1xf32>
    %16 = vector.broadcast %15 : vector<16x1xf32> to vector<16x32xf32>
    %17 = vector.broadcast %10 : vector<1x32xf32> to vector<16x32xf32>
    %18 = arith.mulf %16, %17 : vector<16x32xf32>
    %19 = vector.broadcast %11 : vector<1x32xf32> to vector<16x32xf32>
    %20 = arith.addf %18, %19 : vector<16x32xf32>
    %c0_23 = arith.constant 0 : index
    %c0_24 = arith.constant 0 : index
    %21 = vector.load %arg1[%c0_23, %c0_24] : memref<8x128xf32, #tpu.memory_space<vmem>>, vector<1x32xf32>
    %c0_25 = arith.constant 0 : index
    %c32_26 = arith.constant 32 : index
    %22 = vector.load %arg1[%c0_25, %c32_26] : memref<8x128xf32, #tpu.memory_space<vmem>>, vector<1x32xf32>
    %c0_27 = arith.constant 0 : index
    %c64_28 = arith.constant 64 : index
    %23 = vector.load %arg1[%c0_27, %c64_28] : memref<8x128xf32, #tpu.memory_space<vmem>>, vector<1x32xf32>
    %c0_29 = arith.constant 0 : index
    %c96_30 = arith.constant 96 : index
    %24 = vector.load %arg1[%c0_29, %c96_30] : memref<8x128xf32, #tpu.memory_space<vmem>>, vector<1x32xf32>
    %c1 = arith.constant 1 : index
    %c0_31 = arith.constant 0 : index
    %25 = vector.load %arg1[%c1, %c0_31] : memref<8x128xf32, #tpu.memory_space<vmem>>, vector<1x96xf32>
    %c1_32 = arith.constant 1 : index
    %c96_33 = arith.constant 96 : index
    %26 = vector.load %arg1[%c1_32, %c96_33] : memref<8x128xf32, #tpu.memory_space<vmem>>, vector<1x32xf32>
    %c2 = arith.constant 2 : index
    %c0_34 = arith.constant 0 : index
    %27 = vector.load %arg1[%c2, %c0_34] : memref<8x128xf32, #tpu.memory_space<vmem>>, vector<1x64xf32>
    %c2_35 = arith.constant 2 : index
    %c64_36 = arith.constant 64 : index
    %28 = vector.load %arg1[%c2_35, %c64_36] : memref<8x128xf32, #tpu.memory_space<vmem>>, vector<1x32xf32>
    %c0_37 = arith.constant 0 : index
    %c0_38 = arith.constant 0 : index
    %c0_39 = arith.constant 0 : index
    %29 = vector.load %arg4[%c0_37, %c0_38, %c0_39] : memref<2x32x192xf32, #tpu.memory_space<vmem>>, vector<1x32x96xf32>
    %30 = vector.shape_cast %29 : vector<1x32x96xf32> to vector<32x96xf32>
    %c0_40 = arith.constant 0 : index
    %c0_41 = arith.constant 0 : index
    %c96_42 = arith.constant 96 : index
    %31 = vector.load %arg4[%c0_40, %c0_41, %c96_42] : memref<2x32x192xf32, #tpu.memory_space<vmem>>, vector<1x32x32xf32>
    %32 = vector.shape_cast %31 : vector<1x32x32xf32> to vector<32x32xf32>
    %c0_43 = arith.constant 0 : index
    %c0_44 = arith.constant 0 : index
    %c128_45 = arith.constant 128 : index
    %33 = vector.load %arg4[%c0_43, %c0_44, %c128_45] : memref<2x32x192xf32, #tpu.memory_space<vmem>>, vector<1x32x64xf32>
    %34 = vector.shape_cast %33 : vector<1x32x64xf32> to vector<32x64xf32>
    %c0_46 = arith.constant 0 : index
    %c320 = arith.constant 320 : index
    %35 = vector.load %arg3[%c0_46, %c320] : memref<64x384xf32, #tpu.memory_space<vmem>>, vector<64x32xf32>
    %cst = arith.constant dense<0.000000e+00> : vector<16xf32>
    %36 = vector.multi_reduction <add>, %20, %cst [1] : vector<16x32xf32> to vector<16xf32>
    %37 = vector.shape_cast %36 : vector<16xf32> to vector<16x1xf32>
    %cst_47 = arith.constant 3.200000e+01 : f32
    %38 = vector.broadcast %cst_47 : f32 to vector<16x1xf32>
    %39 = arith.divf %37, %38 : vector<16x1xf32>
    %40 = vector.broadcast %39 : vector<16x1xf32> to vector<16x32xf32>
    %41 = arith.subf %20, %40 : vector<16x32xf32>
    %42 = arith.mulf %41, %41 : vector<16x32xf32>
    %cst_48 = arith.constant dense<0.000000e+00> : vector<16xf32>
    %43 = vector.multi_reduction <add>, %42, %cst_48 [1] : vector<16x32xf32> to vector<16xf32>
    %44 = vector.shape_cast %43 : vector<16xf32> to vector<16x1xf32>
    %cst_49 = arith.constant 3.200000e+01 : f32
    %45 = vector.broadcast %cst_49 : f32 to vector<16x1xf32>
    %46 = arith.divf %44, %45 : vector<16x1xf32>
    %cst_50 = arith.constant 9.99999974E-6 : f32
    %47 = vector.broadcast %cst_50 : f32 to vector<16x1xf32>
    %48 = arith.addf %46, %47 : vector<16x1xf32>
    %49 = math.rsqrt %48 : vector<16x1xf32>
    %50 = vector.broadcast %49 : vector<16x1xf32> to vector<16x32xf32>
    %51 = arith.mulf %41, %50 : vector<16x32xf32>
    %52 = vector.broadcast %21 : vector<1x32xf32> to vector<16x32xf32>
    %53 = arith.mulf %51, %52 : vector<16x32xf32>
    %54 = vector.broadcast %22 : vector<1x32xf32> to vector<16x32xf32>
    %55 = arith.addf %53, %54 : vector<16x32xf32>
    %cst_51 = arith.constant dense<0.000000e+00> : vector<16x96xf32>
    %56 = tpu.matmul %55, %30, %cst_51 {dimension_numbers = #tpu.dot_dimension_numbers<[1], [0], [0], [1], [0, 0, 1, 1], [], []>} : vector<16x32xf32>, vector<32x96xf32>, vector<16x96xf32> -> vector<16x96xf32>
    %57 = vector.broadcast %25 : vector<1x96xf32> to vector<16x96xf32>
    %58 = arith.addf %56, %57 : vector<16x96xf32>
    %59 = vector.extract_strided_slice %58 {offsets = [0, 0], sizes = [16, 64], strides = [1, 1]} : vector<16x96xf32> to vector<16x64xf32>
    %60 = arith.mulf %59, %0 : vector<16x64xf32>
    %cst_52 = arith.constant dense<0.000000e+00> : vector<16x64xf32>
    %61 = tpu.matmul %59, %4, %cst_52 {dimension_numbers = #tpu.dot_dimension_numbers<[1], [0], [0], [1], [0, 0, 1, 1], [], []>} : vector<16x64xf32>, vector<64x64xf32>, vector<16x64xf32> -> vector<16x64xf32>
    %62 = arith.mulf %61, %1 : vector<16x64xf32>
    %63 = arith.addf %60, %62 : vector<16x64xf32>
    %64 = vector.extract_strided_slice %63 {offsets = [0, 0], sizes = [16, 32], strides = [1, 1]} : vector<16x64xf32> to vector<16x32xf32>
    %65 = vector.extract_strided_slice %63 {offsets = [0, 32], sizes = [16, 32], strides = [1, 1]} : vector<16x64xf32> to vector<16x32xf32>
    %66 = vector.extract_strided_slice %58 {offsets = [0, 64], sizes = [16, 32], strides = [1, 1]} : vector<16x96xf32> to vector<16x32xf32>
    %67 = tpu.transpose %65, [1, 0] : vector<16x32xf32> -> vector<32x16xf32>
    %68 = tpu.concatenate %67, %67, %67, %67 in 1 : vector<32x16xf32>, vector<32x16xf32>, vector<32x16xf32>, vector<32x16xf32> -> vector<32x64xf32>
    %69 = arith.mulf %68, %8 : vector<32x64xf32>
    %cst_53 = arith.constant dense<0.000000e+00> : vector<16x64xf32>
    %70 = tpu.matmul %64, %69, %cst_53 {dimension_numbers = #tpu.dot_dimension_numbers<[1], [0], [0], [1], [0, 0, 1, 1], [], []>} : vector<16x32xf32>, vector<32x64xf32>, vector<16x64xf32> -> vector<16x64xf32>
    %cst_54 = arith.constant 0.353553385 : f32
    %71 = vector.broadcast %cst_54 : f32 to vector<16x64xf32>
    %72 = arith.mulf %70, %71 : vector<16x64xf32>
    %73 = arith.addf %72, %2 : vector<16x64xf32>
    %cst_55 = arith.constant dense<0xFF800000> : vector<16xf32>
    %74 = vector.multi_reduction <maximumf>, %73, %cst_55 [1] : vector<16x64xf32> to vector<16xf32>
    %75 = vector.shape_cast %74 : vector<16xf32> to vector<16x1xf32>
    %76 = vector.broadcast %75 : vector<16x1xf32> to vector<16x64xf32>
    %77 = arith.subf %73, %76 : vector<16x64xf32>
    %78 = math.exp %77 : vector<16x64xf32>
    %79 = tpu.concatenate %66, %66, %66, %66 in 0 : vector<16x32xf32>, vector<16x32xf32>, vector<16x32xf32>, vector<16x32xf32> -> vector<64x32xf32>
    %80 = arith.mulf %79, %5 : vector<64x32xf32>
    %cst_56 = arith.constant dense<0.000000e+00> : vector<16x32xf32>
    %81 = tpu.matmul %78, %5, %cst_56 {dimension_numbers = #tpu.dot_dimension_numbers<[1], [0], [0], [1], [0, 0, 1, 1], [], []>} : vector<16x64xf32>, vector<64x32xf32>, vector<16x32xf32> -> vector<16x32xf32>
    %cst_57 = arith.constant dense<0.000000e+00> : vector<16x32xf32>
    %82 = tpu.matmul %78, %80, %cst_57 {dimension_numbers = #tpu.dot_dimension_numbers<[1], [0], [0], [1], [0, 0, 1, 1], [], []>} : vector<16x64xf32>, vector<64x32xf32>, vector<16x32xf32> -> vector<16x32xf32>
    %83 = arith.divf %82, %81 : vector<16x32xf32>
    %cst_58 = arith.constant dense<0.000000e+00> : vector<16x32xf32>
    %84 = tpu.matmul %83, %32, %cst_58 {dimension_numbers = #tpu.dot_dimension_numbers<[1], [0], [0], [1], [0, 0, 1, 1], [], []>} : vector<16x32xf32>, vector<32x32xf32>, vector<16x32xf32> -> vector<16x32xf32>
    %85 = arith.addf %20, %84 : vector<16x32xf32>
    %86 = vector.broadcast %26 : vector<1x32xf32> to vector<16x32xf32>
    %87 = arith.addf %85, %86 : vector<16x32xf32>
    %cst_59 = arith.constant dense<0.000000e+00> : vector<16xf32>
    %88 = vector.multi_reduction <add>, %87, %cst_59 [1] : vector<16x32xf32> to vector<16xf32>
    %89 = vector.shape_cast %88 : vector<16xf32> to vector<16x1xf32>
    %cst_60 = arith.constant 3.200000e+01 : f32
    %90 = vector.broadcast %cst_60 : f32 to vector<16x1xf32>
    %91 = arith.divf %89, %90 : vector<16x1xf32>
    %92 = vector.broadcast %91 : vector<16x1xf32> to vector<16x32xf32>
    %93 = arith.subf %87, %92 : vector<16x32xf32>
    %94 = arith.mulf %93, %93 : vector<16x32xf32>
    %cst_61 = arith.constant dense<0.000000e+00> : vector<16xf32>
    %95 = vector.multi_reduction <add>, %94, %cst_61 [1] : vector<16x32xf32> to vector<16xf32>
    %96 = vector.shape_cast %95 : vector<16xf32> to vector<16x1xf32>
    %cst_62 = arith.constant 3.200000e+01 : f32
    %97 = vector.broadcast %cst_62 : f32 to vector<16x1xf32>
    %98 = arith.divf %96, %97 : vector<16x1xf32>
    %cst_63 = arith.constant 9.99999974E-6 : f32
    %99 = vector.broadcast %cst_63 : f32 to vector<16x1xf32>
    %100 = arith.addf %98, %99 : vector<16x1xf32>
    %101 = math.rsqrt %100 : vector<16x1xf32>
    %102 = vector.broadcast %101 : vector<16x1xf32> to vector<16x32xf32>
    %103 = arith.mulf %93, %102 : vector<16x32xf32>
    %104 = vector.broadcast %23 : vector<1x32xf32> to vector<16x32xf32>
    %105 = arith.mulf %103, %104 : vector<16x32xf32>
    %106 = vector.broadcast %24 : vector<1x32xf32> to vector<16x32xf32>
    %107 = arith.addf %105, %106 : vector<16x32xf32>
    %cst_64 = arith.constant dense<0.000000e+00> : vector<16x64xf32>
    %108 = tpu.matmul %107, %34, %cst_64 {dimension_numbers = #tpu.dot_dimension_numbers<[1], [0], [0], [1], [0, 0, 1, 1], [], []>} : vector<16x32xf32>, vector<32x64xf32>, vector<16x64xf32> -> vector<16x64xf32>
    %109 = vector.broadcast %27 : vector<1x64xf32> to vector<16x64xf32>
    %110 = arith.addf %108, %109 : vector<16x64xf32>
    %cst_65 = arith.constant 5.000000e-01 : f32
    %111 = vector.broadcast %cst_65 : f32 to vector<16x64xf32>
    %112 = arith.mulf %111, %110 : vector<16x64xf32>
    %cst_66 = arith.constant 4.471500e-02 : f32
    %113 = vector.broadcast %cst_66 : f32 to vector<16x64xf32>
    %114 = arith.mulf %113, %110 : vector<16x64xf32>
    %115 = arith.mulf %114, %110 : vector<16x64xf32>
    %116 = arith.mulf %115, %110 : vector<16x64xf32>
    %117 = arith.addf %110, %116 : vector<16x64xf32>
    %cst_67 = arith.constant 0.797884583 : f32
    %118 = vector.broadcast %cst_67 : f32 to vector<16x64xf32>
    %119 = arith.mulf %118, %117 : vector<16x64xf32>
    %120 = math.tanh %119 : vector<16x64xf32>
    %cst_68 = arith.constant 1.000000e+00 : f32
    %121 = vector.broadcast %cst_68 : f32 to vector<16x64xf32>
    %122 = arith.addf %121, %120 : vector<16x64xf32>
    %123 = arith.mulf %112, %122 : vector<16x64xf32>
    %cst_69 = arith.constant dense<0.000000e+00> : vector<16x32xf32>
    %124 = tpu.matmul %123, %35, %cst_69 {dimension_numbers = #tpu.dot_dimension_numbers<[1], [0], [0], [1], [0, 0, 1, 1], [], []>} : vector<16x64xf32>, vector<64x32xf32>, vector<16x32xf32> -> vector<16x32xf32>
    %125 = arith.addf %87, %124 : vector<16x32xf32>
    %126 = vector.broadcast %28 : vector<1x32xf32> to vector<16x32xf32>
    %127 = arith.addf %125, %126 : vector<16x32xf32>
    %c3 = arith.constant 3 : index
    %c0_70 = arith.constant 0 : index
    %128 = vector.load %arg1[%c3, %c0_70] : memref<8x128xf32, #tpu.memory_space<vmem>>, vector<1x32xf32>
    %c3_71 = arith.constant 3 : index
    %c32_72 = arith.constant 32 : index
    %129 = vector.load %arg1[%c3_71, %c32_72] : memref<8x128xf32, #tpu.memory_space<vmem>>, vector<1x32xf32>
    %c3_73 = arith.constant 3 : index
    %c64_74 = arith.constant 64 : index
    %130 = vector.load %arg1[%c3_73, %c64_74] : memref<8x128xf32, #tpu.memory_space<vmem>>, vector<1x32xf32>
    %c3_75 = arith.constant 3 : index
    %c96_76 = arith.constant 96 : index
    %131 = vector.load %arg1[%c3_75, %c96_76] : memref<8x128xf32, #tpu.memory_space<vmem>>, vector<1x32xf32>
    %c4 = arith.constant 4 : index
    %c0_77 = arith.constant 0 : index
    %132 = vector.load %arg1[%c4, %c0_77] : memref<8x128xf32, #tpu.memory_space<vmem>>, vector<1x96xf32>
    %c4_78 = arith.constant 4 : index
    %c96_79 = arith.constant 96 : index
    %133 = vector.load %arg1[%c4_78, %c96_79] : memref<8x128xf32, #tpu.memory_space<vmem>>, vector<1x32xf32>
    %c5 = arith.constant 5 : index
    %c0_80 = arith.constant 0 : index
    %134 = vector.load %arg1[%c5, %c0_80] : memref<8x128xf32, #tpu.memory_space<vmem>>, vector<1x64xf32>
    %c5_81 = arith.constant 5 : index
    %c64_82 = arith.constant 64 : index
    %135 = vector.load %arg1[%c5_81, %c64_82] : memref<8x128xf32, #tpu.memory_space<vmem>>, vector<1x32xf32>
    %c1_83 = arith.constant 1 : index
    %c0_84 = arith.constant 0 : index
    %c0_85 = arith.constant 0 : index
    %136 = vector.load %arg4[%c1_83, %c0_84, %c0_85] : memref<2x32x192xf32, #tpu.memory_space<vmem>>, vector<1x32x96xf32>
    %137 = vector.shape_cast %136 : vector<1x32x96xf32> to vector<32x96xf32>
    %c1_86 = arith.constant 1 : index
    %c0_87 = arith.constant 0 : index
    %c96_88 = arith.constant 96 : index
    %138 = vector.load %arg4[%c1_86, %c0_87, %c96_88] : memref<2x32x192xf32, #tpu.memory_space<vmem>>, vector<1x32x32xf32>
    %139 = vector.shape_cast %138 : vector<1x32x32xf32> to vector<32x32xf32>
    %c1_89 = arith.constant 1 : index
    %c0_90 = arith.constant 0 : index
    %c128_91 = arith.constant 128 : index
    %140 = vector.load %arg4[%c1_89, %c0_90, %c128_91] : memref<2x32x192xf32, #tpu.memory_space<vmem>>, vector<1x32x64xf32>
    %141 = vector.shape_cast %140 : vector<1x32x64xf32> to vector<32x64xf32>
    %c0_92 = arith.constant 0 : index
    %c352 = arith.constant 352 : index
    %142 = vector.load %arg3[%c0_92, %c352] : memref<64x384xf32, #tpu.memory_space<vmem>>, vector<64x32xf32>
    %cst_93 = arith.constant dense<0.000000e+00> : vector<16xf32>
    %143 = vector.multi_reduction <add>, %127, %cst_93 [1] : vector<16x32xf32> to vector<16xf32>
    %144 = vector.shape_cast %143 : vector<16xf32> to vector<16x1xf32>
    %cst_94 = arith.constant 3.200000e+01 : f32
    %145 = vector.broadcast %cst_94 : f32 to vector<16x1xf32>
    %146 = arith.divf %144, %145 : vector<16x1xf32>
    %147 = vector.broadcast %146 : vector<16x1xf32> to vector<16x32xf32>
    %148 = arith.subf %127, %147 : vector<16x32xf32>
    %149 = arith.mulf %148, %148 : vector<16x32xf32>
    %cst_95 = arith.constant dense<0.000000e+00> : vector<16xf32>
    %150 = vector.multi_reduction <add>, %149, %cst_95 [1] : vector<16x32xf32> to vector<16xf32>
    %151 = vector.shape_cast %150 : vector<16xf32> to vector<16x1xf32>
    %cst_96 = arith.constant 3.200000e+01 : f32
    %152 = vector.broadcast %cst_96 : f32 to vector<16x1xf32>
    %153 = arith.divf %151, %152 : vector<16x1xf32>
    %cst_97 = arith.constant 9.99999974E-6 : f32
    %154 = vector.broadcast %cst_97 : f32 to vector<16x1xf32>
    %155 = arith.addf %153, %154 : vector<16x1xf32>
    %156 = math.rsqrt %155 : vector<16x1xf32>
    %157 = vector.broadcast %156 : vector<16x1xf32> to vector<16x32xf32>
    %158 = arith.mulf %148, %157 : vector<16x32xf32>
    %159 = vector.broadcast %128 : vector<1x32xf32> to vector<16x32xf32>
    %160 = arith.mulf %158, %159 : vector<16x32xf32>
    %161 = vector.broadcast %129 : vector<1x32xf32> to vector<16x32xf32>
    %162 = arith.addf %160, %161 : vector<16x32xf32>
    %cst_98 = arith.constant dense<0.000000e+00> : vector<16x96xf32>
    %163 = tpu.matmul %162, %137, %cst_98 {dimension_numbers = #tpu.dot_dimension_numbers<[1], [0], [0], [1], [0, 0, 1, 1], [], []>} : vector<16x32xf32>, vector<32x96xf32>, vector<16x96xf32> -> vector<16x96xf32>
    %164 = vector.broadcast %132 : vector<1x96xf32> to vector<16x96xf32>
    %165 = arith.addf %163, %164 : vector<16x96xf32>
    %166 = vector.extract_strided_slice %165 {offsets = [0, 0], sizes = [16, 64], strides = [1, 1]} : vector<16x96xf32> to vector<16x64xf32>
    %167 = arith.mulf %166, %0 : vector<16x64xf32>
    %cst_99 = arith.constant dense<0.000000e+00> : vector<16x64xf32>
    %168 = tpu.matmul %166, %4, %cst_99 {dimension_numbers = #tpu.dot_dimension_numbers<[1], [0], [0], [1], [0, 0, 1, 1], [], []>} : vector<16x64xf32>, vector<64x64xf32>, vector<16x64xf32> -> vector<16x64xf32>
    %169 = arith.mulf %168, %1 : vector<16x64xf32>
    %170 = arith.addf %167, %169 : vector<16x64xf32>
    %171 = vector.extract_strided_slice %170 {offsets = [0, 0], sizes = [16, 32], strides = [1, 1]} : vector<16x64xf32> to vector<16x32xf32>
    %172 = vector.extract_strided_slice %170 {offsets = [0, 32], sizes = [16, 32], strides = [1, 1]} : vector<16x64xf32> to vector<16x32xf32>
    %173 = vector.extract_strided_slice %165 {offsets = [0, 64], sizes = [16, 32], strides = [1, 1]} : vector<16x96xf32> to vector<16x32xf32>
    %174 = tpu.transpose %172, [1, 0] : vector<16x32xf32> -> vector<32x16xf32>
    %175 = tpu.concatenate %174, %174, %174, %174 in 1 : vector<32x16xf32>, vector<32x16xf32>, vector<32x16xf32>, vector<32x16xf32> -> vector<32x64xf32>
    %176 = arith.mulf %175, %8 : vector<32x64xf32>
    %cst_100 = arith.constant dense<0.000000e+00> : vector<16x64xf32>
    %177 = tpu.matmul %171, %176, %cst_100 {dimension_numbers = #tpu.dot_dimension_numbers<[1], [0], [0], [1], [0, 0, 1, 1], [], []>} : vector<16x32xf32>, vector<32x64xf32>, vector<16x64xf32> -> vector<16x64xf32>
    %cst_101 = arith.constant 0.353553385 : f32
    %178 = vector.broadcast %cst_101 : f32 to vector<16x64xf32>
    %179 = arith.mulf %177, %178 : vector<16x64xf32>
    %180 = arith.addf %179, %2 : vector<16x64xf32>
    %cst_102 = arith.constant dense<0xFF800000> : vector<16xf32>
    %181 = vector.multi_reduction <maximumf>, %180, %cst_102 [1] : vector<16x64xf32> to vector<16xf32>
    %182 = vector.shape_cast %181 : vector<16xf32> to vector<16x1xf32>
    %183 = vector.broadcast %182 : vector<16x1xf32> to vector<16x64xf32>
    %184 = arith.subf %180, %183 : vector<16x64xf32>
    %185 = math.exp %184 : vector<16x64xf32>
    %186 = tpu.concatenate %173, %173, %173, %173 in 0 : vector<16x32xf32>, vector<16x32xf32>, vector<16x32xf32>, vector<16x32xf32> -> vector<64x32xf32>
    %187 = arith.mulf %186, %5 : vector<64x32xf32>
    %cst_103 = arith.constant dense<0.000000e+00> : vector<16x32xf32>
    %188 = tpu.matmul %185, %5, %cst_103 {dimension_numbers = #tpu.dot_dimension_numbers<[1], [0], [0], [1], [0, 0, 1, 1], [], []>} : vector<16x64xf32>, vector<64x32xf32>, vector<16x32xf32> -> vector<16x32xf32>
    %cst_104 = arith.constant dense<0.000000e+00> : vector<16x32xf32>
    %189 = tpu.matmul %185, %187, %cst_104 {dimension_numbers = #tpu.dot_dimension_numbers<[1], [0], [0], [1], [0, 0, 1, 1], [], []>} : vector<16x64xf32>, vector<64x32xf32>, vector<16x32xf32> -> vector<16x32xf32>
    %190 = arith.divf %189, %188 : vector<16x32xf32>
    %cst_105 = arith.constant dense<0.000000e+00> : vector<16x32xf32>
    %191 = tpu.matmul %190, %139, %cst_105 {dimension_numbers = #tpu.dot_dimension_numbers<[1], [0], [0], [1], [0, 0, 1, 1], [], []>} : vector<16x32xf32>, vector<32x32xf32>, vector<16x32xf32> -> vector<16x32xf32>
    %192 = arith.addf %127, %191 : vector<16x32xf32>
    %193 = vector.broadcast %133 : vector<1x32xf32> to vector<16x32xf32>
    %194 = arith.addf %192, %193 : vector<16x32xf32>
    %cst_106 = arith.constant dense<0.000000e+00> : vector<16xf32>
    %195 = vector.multi_reduction <add>, %194, %cst_106 [1] : vector<16x32xf32> to vector<16xf32>
    %196 = vector.shape_cast %195 : vector<16xf32> to vector<16x1xf32>
    %cst_107 = arith.constant 3.200000e+01 : f32
    %197 = vector.broadcast %cst_107 : f32 to vector<16x1xf32>
    %198 = arith.divf %196, %197 : vector<16x1xf32>
    %199 = vector.broadcast %198 : vector<16x1xf32> to vector<16x32xf32>
    %200 = arith.subf %194, %199 : vector<16x32xf32>
    %201 = arith.mulf %200, %200 : vector<16x32xf32>
    %cst_108 = arith.constant dense<0.000000e+00> : vector<16xf32>
    %202 = vector.multi_reduction <add>, %201, %cst_108 [1] : vector<16x32xf32> to vector<16xf32>
    %203 = vector.shape_cast %202 : vector<16xf32> to vector<16x1xf32>
    %cst_109 = arith.constant 3.200000e+01 : f32
    %204 = vector.broadcast %cst_109 : f32 to vector<16x1xf32>
    %205 = arith.divf %203, %204 : vector<16x1xf32>
    %cst_110 = arith.constant 9.99999974E-6 : f32
    %206 = vector.broadcast %cst_110 : f32 to vector<16x1xf32>
    %207 = arith.addf %205, %206 : vector<16x1xf32>
    %208 = math.rsqrt %207 : vector<16x1xf32>
    %209 = vector.broadcast %208 : vector<16x1xf32> to vector<16x32xf32>
    %210 = arith.mulf %200, %209 : vector<16x32xf32>
    %211 = vector.broadcast %130 : vector<1x32xf32> to vector<16x32xf32>
    %212 = arith.mulf %210, %211 : vector<16x32xf32>
    %213 = vector.broadcast %131 : vector<1x32xf32> to vector<16x32xf32>
    %214 = arith.addf %212, %213 : vector<16x32xf32>
    %cst_111 = arith.constant dense<0.000000e+00> : vector<16x64xf32>
    %215 = tpu.matmul %214, %141, %cst_111 {dimension_numbers = #tpu.dot_dimension_numbers<[1], [0], [0], [1], [0, 0, 1, 1], [], []>} : vector<16x32xf32>, vector<32x64xf32>, vector<16x64xf32> -> vector<16x64xf32>
    %216 = vector.broadcast %134 : vector<1x64xf32> to vector<16x64xf32>
    %217 = arith.addf %215, %216 : vector<16x64xf32>
    %cst_112 = arith.constant 5.000000e-01 : f32
    %218 = vector.broadcast %cst_112 : f32 to vector<16x64xf32>
    %219 = arith.mulf %218, %217 : vector<16x64xf32>
    %cst_113 = arith.constant 4.471500e-02 : f32
    %220 = vector.broadcast %cst_113 : f32 to vector<16x64xf32>
    %221 = arith.mulf %220, %217 : vector<16x64xf32>
    %222 = arith.mulf %221, %217 : vector<16x64xf32>
    %223 = arith.mulf %222, %217 : vector<16x64xf32>
    %224 = arith.addf %217, %223 : vector<16x64xf32>
    %cst_114 = arith.constant 0.797884583 : f32
    %225 = vector.broadcast %cst_114 : f32 to vector<16x64xf32>
    %226 = arith.mulf %225, %224 : vector<16x64xf32>
    %227 = math.tanh %226 : vector<16x64xf32>
    %cst_115 = arith.constant 1.000000e+00 : f32
    %228 = vector.broadcast %cst_115 : f32 to vector<16x64xf32>
    %229 = arith.addf %228, %227 : vector<16x64xf32>
    %230 = arith.mulf %219, %229 : vector<16x64xf32>
    %cst_116 = arith.constant dense<0.000000e+00> : vector<16x32xf32>
    %231 = tpu.matmul %230, %142, %cst_116 {dimension_numbers = #tpu.dot_dimension_numbers<[1], [0], [0], [1], [0, 0, 1, 1], [], []>} : vector<16x64xf32>, vector<64x32xf32>, vector<16x32xf32> -> vector<16x32xf32>
    %232 = arith.addf %194, %231 : vector<16x32xf32>
    %233 = vector.broadcast %135 : vector<1x32xf32> to vector<16x32xf32>
    %234 = arith.addf %232, %233 : vector<16x32xf32>
    %cst_117 = arith.constant dense<0.000000e+00> : vector<16xf32>
    %235 = vector.multi_reduction <add>, %234, %cst_117 [1] : vector<16x32xf32> to vector<16xf32>
    %236 = vector.shape_cast %235 : vector<16xf32> to vector<16x1xf32>
    %cst_118 = arith.constant 3.200000e+01 : f32
    %237 = vector.broadcast %cst_118 : f32 to vector<16x1xf32>
    %238 = arith.divf %236, %237 : vector<16x1xf32>
    %239 = vector.broadcast %238 : vector<16x1xf32> to vector<16x32xf32>
    %240 = arith.subf %234, %239 : vector<16x32xf32>
    %241 = arith.mulf %240, %240 : vector<16x32xf32>
    %cst_119 = arith.constant dense<0.000000e+00> : vector<16xf32>
    %242 = vector.multi_reduction <add>, %241, %cst_119 [1] : vector<16x32xf32> to vector<16xf32>
    %243 = vector.shape_cast %242 : vector<16xf32> to vector<16x1xf32>
    %cst_120 = arith.constant 3.200000e+01 : f32
    %244 = vector.broadcast %cst_120 : f32 to vector<16x1xf32>
    %245 = arith.divf %243, %244 : vector<16x1xf32>
    %cst_121 = arith.constant 9.99999974E-6 : f32
    %246 = vector.broadcast %cst_121 : f32 to vector<16x1xf32>
    %247 = arith.addf %245, %246 : vector<16x1xf32>
    %248 = math.rsqrt %247 : vector<16x1xf32>
    %249 = vector.broadcast %248 : vector<16x1xf32> to vector<16x32xf32>
    %250 = arith.mulf %240, %249 : vector<16x32xf32>
    %251 = vector.broadcast %12 : vector<1x32xf32> to vector<16x32xf32>
    %252 = arith.mulf %250, %251 : vector<16x32xf32>
    %253 = vector.broadcast %13 : vector<1x32xf32> to vector<16x32xf32>
    %254 = arith.addf %252, %253 : vector<16x32xf32>
    %cst_122 = arith.constant dense<0.000000e+00> : vector<16x64xf32>
    %255 = tpu.matmul %254, %9, %cst_122 {dimension_numbers = #tpu.dot_dimension_numbers<[1], [0], [0], [1], [0, 0, 1, 1], [], []>} : vector<16x32xf32>, vector<32x64xf32>, vector<16x64xf32> -> vector<16x64xf32>
    %256 = arith.mulf %255, %3 : vector<16x64xf32>
    %cst_123 = arith.constant dense<0.000000e+00> : vector<8x64xf32>
    %257 = tpu.matmul %6, %256, %cst_123 {dimension_numbers = #tpu.dot_dimension_numbers<[1], [0], [0], [1], [0, 0, 1, 1], [], []>} : vector<8x16xf32>, vector<16x64xf32>, vector<8x64xf32> -> vector<8x64xf32>
    %cst_124 = arith.constant dense<0.000000e+00> : vector<8x128xf32>
    %258 = tpu.matmul %257, %7, %cst_124 {dimension_numbers = #tpu.dot_dimension_numbers<[1], [0], [0], [1], [0, 0, 1, 1], [], []>} : vector<8x64xf32>, vector<64x128xf32>, vector<8x128xf32> -> vector<8x128xf32>
    %259 = vector.broadcast %14 : vector<1x128xf32> to vector<8x128xf32>
    %260 = arith.addf %258, %259 : vector<8x128xf32>
    %c0_125 = arith.constant 0 : index
    %c0_126 = arith.constant 0 : index
    %261 = vector.load %arg5[%c0_125, %c0_126] : memref<8x128xf32, #tpu.memory_space<vmem>>, vector<8x128xf32>
    tpu.vector_store %arg5[%c0_125, %c0_126], %260 {strides = array<i32>} : memref<8x128xf32, #tpu.memory_space<vmem>>, vector<8x128xf32>,
    return
  }
}

</mosaic_0001>

<bundles_post_ra>
// kernel: timeseries_forward.1
= control target key start
LH: loop header
LB: loop body
LE: loop exit
PB: predicated region body
PF: predicated region fallthrough
CT: control target
= control target key end

     0   :  { %10 = vsyncpa [#allocation3], 0  ;;  %s3912_s0 = inlined_call_operand.vmem [shape: f32[16,1], index: 0, kind: input, shape index: {}]   ;;  %s3913_s1 = inlined_call_operand.vmem [shape: f32[8,128], index: 1, kind: input, shape index: {}]   ;;  %s3914_s2 = inlined_call_operand.hbm [shape: f32[16,256], index: 2, kind: input, shape index: {}]   ;;  %s3915_s3 = inlined_call_operand.hbm [shape: f32[64,384], index: 3, kind: input, shape index: {}]   ;;  %s3916_s4 = inlined_call_operand.hbm [shape: f32[2,32,192], index: 4, kind: input, shape index: {}]   ;;  %s3917_s5 = inlined_call_operand.vmem [shape: f32[8,128], index: 5, kind: output, shape index: {}]  }
   0x1   :  { %11 = vsyncpa [#allocation5], 0  ;;  %s3332_s18 = smov [#allocation4]   ;;  %s3262_s22 = scalar_lea.hbm %s3915_s3, 3072 }
   0x2   :  { %s33_s19 = sshll.u32 %s3332_s18, 4  ;;  %p3263_p0 = scmp.ne.s32.totalorder %s3915_s3, %s3262_s22  ;;  %s34_s19 = int_to_ptr.vmem [resolvable:$true] %s33_s19 }
   0x3   :  { %p3266_p1 = scmp.lt.u32.totalorder %s3262_s22, %s3915_s3 }
   0x5   :  { %p3268_p2 = pnand %p3266_p1, %p3263_p0 }
   0x7   :  { %3271 = shalt.err (!%p3268_p2)
}
   0x8   :  { %s3272_s27 = scalar_lea.vmem %s34_s19, 3072  ;;  %p3277_p4 = scmp.lt.s32.totalorder %s34_s19, %s34_s19 }
   0x9   :  { %p3273_p3 = scmp.ne.s32.totalorder %s34_s19, %s3272_s27  ;;  %p3278_p5 = scmp.lt.s32.totalorder %s3272_s27, %s3272_s27 }
   0xb   :  { %p3279_p6 = por %p3278_p5, %p3277_p4 }
   0xd   :  { %p3280_p7 = pnand %p3279_p6, %p3273_p3 }
   0xf   :  { %3283 = shalt.err (!%p3280_p7)
}
  0x10   :  { %s3333_s28 = smov 384   ;;  %s3334_s29 = smov 24  }
  0x11   :  { %39 = dma.hbm_to_vmem [thread:$0]  %s3915_s3, 3072, %s34_s19, [#allocation5], %s3333_s28, %s3333_s28, %s3334_s29  }
  0x12   :  { %s3335_s7 = smov [#allocation2]   ;;  %s3284_s11 = scalar_lea.hbm %s3914_s2, 512 }
  0x13   :  { %s21_s8 = sshll.u32 %s3335_s7, 4  ;;  %p3285_p8 = scmp.ne.s32.totalorder %s3914_s2, %s3284_s11  ;;  %s22_s8 = int_to_ptr.vmem [resolvable:$true] %s21_s8 }
  0x14   :  { %p3288_p9 = scmp.lt.u32.totalorder %s3284_s11, %s3914_s2 }
  0x16   :  { %p3290_p10 = pnand %p3288_p9, %p3285_p8 }
  0x18   :  { %3293 = shalt.err (!%p3290_p10)
}
  0x19   :  { %s3294_s16 = scalar_lea.vmem %s22_s8, 512  ;;  %p3299_p12 = scmp.lt.s32.totalorder %s22_s8, %s22_s8 }
  0x1a   :  { %p3295_p11 = scmp.ne.s32.totalorder %s22_s8, %s3294_s16  ;;  %p3300_p13 = scmp.lt.s32.totalorder %s3294_s16, %s3294_s16 }
  0x1c   :  { %p3301_p0 = por %p3300_p13, %p3299_p12 }
  0x1e   :  { %p3302_p1 = pnand %p3301_p0, %p3295_p11 }
  0x20   :  { %3305 = shalt.err (!%p3302_p1)
}
  0x21   :  { %s3336_s3 = smov 256   ;;  %s3337_s17 = smov 16  }
  0x22   :  { %27 = dma.hbm_to_vmem [thread:$0]  %s3914_s2, 512, %s22_s8, [#allocation3], %s3336_s3, %s3336_s3, %s3337_s17  }
  0x23   :  { %s3338_s20 = smov [#allocation6]   ;;  %s3306_s24 = scalar_lea.hbm %s3916_s4, 2048 }
  0x24   :  { %s45_s21 = sshll.u32 %s3338_s20, 4  ;;  %p3307_p2 = scmp.ne.s32.totalorder %s3916_s4, %s3306_s24  ;;  %s46_s21 = int_to_ptr.vmem [resolvable:$true] %s45_s21 }
  0x25   :  { %p3310_p3 = scmp.lt.u32.totalorder %s3306_s24, %s3916_s4 }
  0x27   :  { %p3312_p4 = pnand %p3310_p3, %p3307_p2 }
  0x29   :  { %3315 = shalt.err (!%p3312_p4)
}
  0x2a   :  { %s3316_s29 = scalar_lea.vmem %s46_s21, 2048  ;;  %p3321_p6 = scmp.lt.s32.totalorder %s46_s21, %s46_s21 }
  0x2b   :  { %p3317_p5 = scmp.ne.s32.totalorder %s46_s21, %s3316_s29  ;;  %p3322_p7 = scmp.lt.s32.totalorder %s3316_s29, %s3316_s29 }
  0x2d   :  { %p3323_p8 = por %p3322_p7, %p3321_p6 }
  0x2f   :  { %p3324_p9 = pnand %p3323_p8, %p3317_p5 }
  0x31   :  { %3327 = shalt.err (!%p3324_p9)
}
  0x32   :  { %51 = dma.hbm_to_vmem [thread:$0]  %s3916_s4, 2048, %s46_s21, [#allocation5], %s3336_s3, %s3336_s3, %s3337_s17  }
  0x33   :  { %3328 = dma.done.wait [#allocation3], 512  }
  0x34   :  { %3329 = vsyncadd [#allocation3], 4294966784 }
  0x35   :  { %3330 = dma.done.wait [#allocation5], 5120  }
  0x36   :  { %3331 = vsyncadd [#allocation5], 4294962176  ;;  %v3339_v0 = vmov 0   ;;  %v91_v1 = vld [vmem:[%s3912_s0] sm:$0xff]  ;;  %s3340_s10 = smov 96   ;;  %v92_v3 = vld [vmem:[%s3912_s0 + $0x8] sm:$0xff] }
  0x37   :  { %3093 = vset.pattern.permute.xlu0 %v3339_v0  ;;  %v2396_v2 = vld [vmem:[%s3913_s1 + $0x6] ss:$0 sm:$0xff]  ;;  %vm130_vm0 = vcmask 261120   ;;  %v3440_v23 = vld [vmem:[%s3913_s1] ss:$0 sm:$0xff]  ;;  %v3446_v25 = vld [vmem:[#allocation6 + $0x10] sm:$0xff] }
  0x38   :  { %95 = vperm.xlu0 %3093, %v91_v1   ;;  %110 = vrot.lane.b32.xlu1 %v2396_v2, %s3340_s10  ;;  %v3444_v24 = vld [vmem:[#allocation6] sm:$0xff]  ;;  %v3454_v29 = vld [vmem:[#allocation6 + $0x30] sm:$0xff]  ;;  %v3460_v32 = vld [vmem:[#allocation4 + $0x18] sm:$0xff]  ;;  %s3341_s13 = smov 64   ;;  %vm257_vm1 = vcmask 523264   ;;  %s3342_s16 = smov 32  }
  0x39   :  { %v3134_v26 = vpack.i.bf16 %v3446_v25, %v3444_v24  ;;  %v2863_v27 = vpack.c.bf16 %v3446_v25, %v3444_v24  ;;  %v3452_v28 = vld [vmem:[#allocation6 + $0x20] sm:$0xff]  ;;  %v3462_v33 = vld [vmem:[#allocation4 + $0x30] sm:$0xff]  ;;  %v3468_v35 = vld [vmem:[#allocation4 + $0x48] sm:$0xff]  ;;  %s3343_s3 = smov 48   ;;  %vm431_vm2 = vcmask 130048   ;;  %vm440_vm3 = vcmask 392192  }
  0x3a   :  { %v2867_v30 = vpack.c.bf16 %v3454_v29, %v3452_v28  ;;  %v3458_v31 = vld [vmem:[#allocation4] sm:$0xff]  ;;  %v3472_v36 = vpack.c.bf16 %v3468_v35, %v3462_v33  ;;  %v3476_v38 = vld [vmem:[#allocation4 + $0x78] sm:$0xff]  ;;  %v3492_v55 = vld [vmem:[#allocation4 + $0x90] sm:$0xff]  ;;  %vm3345_vm4 = vmmov 0  }
  0x3b   :  { %2864 = vmatprep.subr.bf16.mxu0 %v2863_v27  ;;  %v3466_v34 = vpack.c.bf16 %v3460_v32, %v3458_v31  ;;  %v3474_v37 = vld [vmem:[#allocation4 + $0x60] sm:$0xff]  ;;  %v3494_v56 = vld [vmem:[#allocation4 + $0xa8] sm:$0xff]  ;;  %v3506_v59 = vld [vmem:[#allocation2 + $0x10] sm:$0xff] }
  0x3c   :  { %100 = vperm.xlu0 %3093, %v92_v3   ;;  %2866 = vmatpush3.bf16.msra.mxu0 %v2863_v27  ;;  %v3483_v39 = vpack.c.bf16 %v3476_v38, %v3474_v37  ;;  %v3498_v57 = vpack.c.bf16 %v3494_v56, %v3492_v55  ;;  %v3502_v58 = vld [vmem:[#allocation2] sm:$0xff] }
  0x3d   :  { %2868 = vmatprep.subr.bf16.mxu0 %v2867_v30  ;;  %2872 = vmatprep.subr.bf16.mxu1 %v3466_v34  ;;  %v3513_v60 = vld [vmem:[%s3913_s1 + $0x1] ss:$0 sm:$0xff] }
  0x3e   :  { %2874 = vmatpush3.bf16.msra.mxu1 %v3466_v34 }
  0x3f   :  { %2876 = vmatprep.subr.bf16.mxu1 %v3472_v36 }
  0x40   :  { %2870 = vmatpush3.bf16.msra.mxu0 %v2867_v30 }
  0x42   :  { %2878 = vmatpush3.bf16.msra.mxu1 %v3472_v36 }
  0x43   :  { %2880 = vmatprep.subr.bf16.mxu1 %v3483_v39 }
  0x46   :  { %2882 = vmatpush3.bf16.msra.mxu1 %v3483_v39 }
  0x47   :  { %2884 = vmatprep.subr.bf16.mxu1 %v3498_v57 }
  0x4a   :  { %2886 = vmatpush3.bf16.msra.mxu1 %v3498_v57 }
  0xaa   :  { %v111_v5 = vpop.permute.xlu1 %110 }
  0xb7   :  { %v96_v4 = vpop.permute.xlu0 %95 }
  0xb8   :  { %v107_v6 = vmul.f32 %v2396_v2, %v96_v4 }
  0xba   :  { %v3425_v7 = vadd.f32 %v111_v5, %v107_v6 }
  0xbb   :  { %v101_v8 = vpop.permute.xlu0 %100 }
  0xbc   :  { %v108_v9 = vmul.f32 %v2396_v2, %v101_v8  ;;  %v131_v10 = vsel %vm130_vm0, %v3425_v7, 0.0 }
  0xbd   :  { %132 = vadd.xlane.f32.xlu1 %v131_v10 }
  0xbe   :  { %v3429_v11 = vadd.f32 %v111_v5, %v108_v9 }
  0xc0   :  { %v134_v12 = vsel %vm130_vm0, %v3429_v11, 0.0 }
  0xc1   :  { %135 = vadd.xlane.f32.xlu0 %v134_v12 }
 0x14a   :  { %v133_v13 = vpop.xlane.xlu1 %132 }
 0x14b   :  { %v138_v14 = vmul.f32 0.03125, %v133_v13 }
 0x14d   :  { %v140_v15 = vsub.f32 %v3425_v7, %v138_v14 }
 0x14e   :  { %v136_v16 = vpop.xlane.xlu0 %135 }
 0x14f   :  { %v139_v17 = vmul.f32 0.03125, %v136_v16  ;;  %v142_v18 = vmul.f32 %v140_v15, %v140_v15 }
 0x151   :  { %v141_v19 = vsub.f32 %v3429_v11, %v139_v17  ;;  %v144_v20 = vsel %vm130_vm0, %v142_v18, 0.0 }
 0x152   :  { %145 = vadd.xlane.f32.xlu0 %v144_v20 }
 0x153   :  { %v143_v21 = vmul.f32 %v141_v19, %v141_v19 }
 0x155   :  { %v147_v22 = vsel %vm130_vm0, %v143_v21, 0.0 }
 0x156   :  { %148 = vadd.xlane.f32.xlu1 %v147_v22 }
 0x167   :  { %341 = vrot.lane.b32.xlu1 %v3502_v58, %s3341_s13 }
 0x168   :  { %165 = vrot.lane.b32.xlu0 %v3440_v23, %s3340_s10 }
 0x16b   :  { %343 = vrot.lane.b32.xlu1 %v3506_v59, %s3341_s13 }
 0x1df   :  { %v146_v40 = vpop.xlane.xlu0 %145 }
 0x1e0   :  { %v150_v41 = vmul.f32 0.03125, %v146_v40 }
 0x1e2   :  { %v152_v42 = vadd.f32 1e-05, %v150_v41 }
 0x1e3   :  { %v149_v43 = vpop.xlane.xlu1 %148  ;;  %v166_v48 = vpop.permute.xlu0 %165 }
 0x1e4   :  { %3214 = vrsqrt.f32 %v152_v42  ;;  %v151_v44 = vmul.f32 0.03125, %v149_v43 }
 0x1e6   :  { %v153_v45 = vadd.f32 1e-05, %v151_v44 }
 0x1e8   :  { %3216 = vrsqrt.f32 %v153_v45 }
 0x1ee   :  { %v3215_v46 = vpop.eup %3214 }
 0x1ef   :  { %v156_v47 = vmul.f32 %v3215_v46, %v140_v15  ;;  %v3533_v15 = vpop.permute.xlu1 %341  ;;  %v3094_v46 = vpack.i.bf16 %v3460_v32, %v3458_v31 }
 0x1f1   :  { %v162_v49 = vmul.f32 %v3440_v23, %v156_v47  ;;  %v3104_v47 = vpack.i.bf16 %v3476_v38, %v3474_v37 }
 0x1f2   :  { %v3217_v50 = vpop.eup %3216 }
 0x1f3   :  { %v157_v51 = vmul.f32 %v3217_v50, %v141_v19  ;;  %v168_v52 = vadd.f32 %v166_v48, %v162_v49  ;;  %v3535_v16 = vpop.permute.xlu1 %343  ;;  %v3099_v49 = vpack.i.bf16 %v3468_v35, %v3462_v33 }
 0x1f5   :  { %v163_v53 = vmul.f32 %v3440_v23, %v157_v51  ;;  %2594 = vmatprep.mubr.msk.f32.mxu0 %vm130_vm0, %v168_v52 }
 0x1f7   :  { %v169_v54 = vadd.f32 %v166_v48, %v163_v53  ;;  %v3114_v48 = vpack.i.bf16 %v3494_v56, %v3492_v55 }
 0x1f9   :  { %2595 = vmatmul.mubr.msk.f32.vlgmr.msra.gmra.mrb[0].mxu0 %vm130_vm0, %v169_v54 }
 0x2cc   :  { %v2596_v61 = vpop.f32.mrb[0].mxu0 }
 0x2cd   :  { %v252_v62 = vadd.f32 %v2596_v61, %v3513_v60  ;;  %v246_v63 = vpop.f32.mrb[1].mxu0 }
 0x2ce   :  { %v247_v0 = vadd.f32 %v3513_v60, %v246_v63 }
 0x2cf   :  { %v545_v1 = vmul.f32 %v252_v62, %v3460_v32  ;;  %v547_v2 = vmul.f32 %v252_v62, %v3468_v35  ;;  %v551_v3 = vmul.f32 %v252_v62, %v3494_v56  ;;  %v3529_v9 = vmul.f32 %v252_v62, %v3476_v38 }
 0x2d0   :  { %2613 = vmatprep.mubr.msk.f32.mxu1 %vm257_vm1, %v247_v0  ;;  %v544_v4 = vmul.f32 %v247_v0, %v3458_v31  ;;  %v546_v5 = vmul.f32 %v247_v0, %v3462_v33  ;;  %v550_v6 = vmul.f32 %v247_v0, %v3492_v55  ;;  %v3526_v8 = vmul.f32 %v247_v0, %v3474_v37 }
 0x2d1   :  { %2614 = vmatmul.mubr.msk.f32.vlgmr.msra.gmra.mrb[0].mxu1 %vm257_vm1, %v252_v62  ;;  %v256_v18 = vmul.f32 %v252_v62, %v3506_v59  ;;  %v255_v21 = vmul.f32 %v247_v0, %v3502_v58 }
 0x2d2   :  { %v3109_v10 = vpack.i.bf16 %v545_v1, %v544_v4  ;;  %v3119_v12 = vpack.i.bf16 %v547_v2, %v546_v5  ;;  %v3129_v13 = vpack.i.bf16 %v551_v3, %v550_v6  ;;  %v3124_v14 = vpack.i.bf16 %v3529_v9, %v3526_v8  ;;  %v3581_v1 = vld [vmem:[#allocation4 + $0x10] sm:$0xff]  ;;  %v3585_v4 = vld [vmem:[#allocation4 + $0x28] sm:$0xff] }
 0x3a4   :  { %v2615_v17 = vpop.f32.mrb[0].mxu1 }
 0x3a5   :  { %v348_v19 = vmul.f32 %v2615_v17, %v3535_v16  ;;  %v330_v20 = vpop.f32.mrb[1].mxu1 }
 0x3a6   :  { %v347_v22 = vmul.f32 %v3533_v15, %v330_v20 }
 0x3a7   :  { %v3541_v27 = vadd.f32 %v348_v19, %v256_v18 }
 0x3a8   :  { %v349_v30 = vadd.f32 %v347_v22, %v255_v21 }
 0x3a9   :  { %355 = vrot.lane.b32.xlu1 %v3541_v27, %s3340_s10 }
 0x3aa   :  { %353 = vrot.lane.b32.xlu0 %v349_v30, %s3340_s10  ;;  %2624 = vmatprep.mubr.msk.f32.mxu0 %vm130_vm0, %v349_v30 }
 0x41b   :  { %v356_v41 = vpop.permute.xlu1 %355 }
 0x41c   :  { %v354_v40 = vpop.permute.xlu0 %353 }
 0x41d   :  { %359 = vxpose.xlu0.b32.start [1/2] (short) (narrow) %v354_v40, 32 }
 0x421   :  { %360 = vxpose.xlu0.b32.end [2/2] (short) (narrow) %v356_v41, 32 }
 0x49d   :  { %v375_v42 = vpop.trf.xlu0 }
 0x49e   :  { %395 = vrot.lane.b32.xlu1 %v375_v42, %s3337_s17 }
 0x4a1   :  { %v376_v43 = vpop.trf.xlu0 }
 0x4a2   :  { %407 = vrot.lane.b32.xlu1 %v375_v42, %s3342_s16 }
 0x4a5   :  { %v3549_v44 = vpop.trf.xlu0 }
 0x4a6   :  { %419 = vrot.lane.b32.xlu1 %v375_v42, %s3343_s3 }
 0x4a9   :  { %v378_v45 = vpop.trf.xlu0 }
 0x4aa   :  { %397 = vrot.lane.b32.xlu1 %v376_v43, %s3337_s17  ;;  %413 = vrot.lane.b32.xlu0 %v378_v45, %s3342_s16 }
 0x4ae   :  { %409 = vrot.lane.b32.xlu1 %v376_v43, %s3342_s16  ;;  %3095 = vrot.lane.b32.xlu0 %v3094_v46, %s3341_s13 }
 0x4b2   :  { %421 = vrot.lane.b32.xlu1 %v376_v43, %s3343_s3  ;;  %3105 = vrot.lane.b32.xlu0 %v3104_v47, %s3341_s13 }
 0x4b6   :  { %399 = vrot.lane.b32.xlu1 %v3549_v44, %s3337_s17  ;;  %3110 = vrot.lane.b32.xlu0 %v3109_v10, %s3341_s13 }
 0x4ba   :  { %411 = vrot.lane.b32.xlu1 %v3549_v44, %s3342_s16  ;;  %3115 = vrot.lane.b32.xlu0 %v3114_v48, %s3341_s13 }
 0x4be   :  { %3120 = vrot.lane.b32.xlu0 %v3119_v12, %s3341_s13  ;;  %401 = vrot.lane.b32.xlu1 %v378_v45, %s3337_s17 }
 0x4c2   :  { %3130 = vrot.lane.b32.xlu0 %v3129_v13, %s3341_s13  ;;  %423 = vrot.lane.b32.xlu1 %v3549_v44, %s3343_s3 }
 0x4c6   :  { %425 = vrot.lane.b32.xlu1 %v378_v45, %s3343_s3 }
 0x4ca   :  { %3100 = vrot.lane.b32.xlu1 %v3099_v49, %s3341_s13 }
 0x510   :  { %v396_v50 = vpop.permute.xlu1 %395 }
 0x511   :  { %v432_v63 = vsel %vm431_vm2, %v375_v42, %v396_v50 }
 0x514   :  { %v408_v51 = vpop.permute.xlu1 %407 }
 0x515   :  { %v436_v0 = vsel %vm130_vm0, %v432_v63, %v408_v51  ;;  %v3598_v63 = vld [vmem:[#allocation4 + $0x58] sm:$0xff] }
 0x518   :  { %v420_v52 = vpop.permute.xlu1 %419 }
 0x519   :  { %v441_v2 = vsel %vm440_vm3, %v436_v0, %v420_v52 }
 0x51a   :  { %v445_v13 = vmul.f32 %v441_v2, %v3581_v1 }
 0x51c   :  { %v398_v53 = vpop.permute.xlu1 %397  ;;  %v414_v54 = vpop.permute.xlu0 %413 }
 0x51d   :  { %v433_v3 = vsel %vm431_vm2, %v376_v43, %v398_v53  ;;  %v3595_v53 = vld [vmem:[#allocation4 + $0x40] sm:$0xff] }
 0x520   :  { %v410_v61 = vpop.permute.xlu1 %409  ;;  %v3096_v62 = vpop.permute.xlu0 %3095 }
 0x521   :  { %v437_v5 = vsel %vm130_vm0, %v433_v3, %v410_v61  ;;  %v3098_v0 = vunpack.i.h.bf16 %v3096_v62  ;;  %v3097_v2 = vunpack.i.l.bf16 %v3096_v62 }
 0x524   :  { %v422_v6 = vpop.permute.xlu1 %421  ;;  %v3106_v10 = vpop.permute.xlu0 %3105 }
 0x525   :  { %v442_v12 = vsel %vm440_vm3, %v437_v5, %v422_v6  ;;  %v3107_v62 = vunpack.i.l.bf16 %v3106_v10 }
 0x526   :  { %v446_v17 = vmul.f32 %v442_v12, %v3585_v4  ;;  %v3604_v12 = vpack.c.bf16 %v3098_v0, %v3097_v2 }
 0x528   :  { %v400_v18 = vpop.permute.xlu1 %399  ;;  %v3111_v19 = vpop.permute.xlu0 %3110  ;;  %v2887_v20 = vpack.c.bf16 %v446_v17, %v445_v13 }
 0x529   :  { %v3113_v21 = vunpack.i.h.bf16 %v3111_v19  ;;  %v3112_v22 = vunpack.i.l.bf16 %v3111_v19  ;;  %v434_v50 = vsel %vm431_vm2, %v3549_v44, %v400_v18 }
 0x52a   :  { %2888 = vmatprep.subr.bf16.mxu0 %v2887_v20 }
 0x52b   :  { %v2911_v30 = vpack.c.bf16 %v3113_v21, %v3112_v22  ;;  %2890 = vmatpush3.bf16.msra.mxu0 %v2887_v20 }
 0x52c   :  { %v412_v40 = vpop.permute.xlu1 %411  ;;  %v3116_v41 = vpop.permute.xlu0 %3115 }
 0x52d   :  { %2912 = vmatprep.subr.bf16.mxu1 %v2911_v30  ;;  %v438_v52 = vsel %vm130_vm0, %v434_v50, %v412_v40  ;;  %v3118_v21 = vunpack.i.h.bf16 %v3116_v41  ;;  %v3117_v22 = vunpack.i.l.bf16 %v3116_v41 }
 0x52e   :  { %2914 = vmatpush3.bf16.msra.mxu1 %v2911_v30 }
 0x52f   :  { %v3616_v40 = vpack.c.bf16 %v3118_v21, %v3117_v22 }
 0x530   :  { %v3121_v42 = vpop.permute.xlu0 %3120  ;;  %v402_v43 = vpop.permute.xlu1 %401 }
 0x531   :  { %v3123_v46 = vunpack.i.h.bf16 %v3121_v42  ;;  %v3122_v47 = vunpack.i.l.bf16 %v3121_v42  ;;  %v435_v51 = vsel %vm431_vm2, %v378_v45, %v402_v43 }
 0x532   :  { %v439_v3 = vsel %vm130_vm0, %v435_v51, %v414_v54  ;;  %v3108_v54 = vunpack.i.h.bf16 %v3106_v10  ;;  %v3622_v10 = vld [vmem:[#allocation2 + $0x18] sm:$0xff]  ;;  %v3139_v51 = vpack.i.bf16 %v3454_v29, %v3452_v28 }
 0x533   :  { %v2915_v48 = vpack.c.bf16 %v3123_v46, %v3122_v47  ;;  %v3624_v46 = vld [vmem:[#allocation2 + $0x8] sm:$0xff] }
 0x534   :  { %v424_v49 = vpop.permute.xlu1 %423  ;;  %v3610_v20 = vpack.c.bf16 %v3108_v54, %v3107_v62  ;;  %3140 = vrot.lane.b32.xlu0 %v3139_v51, %s3342_s16  ;;  %v3131_v2 = vpop.permute.xlu0 %3130 }
 0x535   :  { %2916 = vmatprep.subr.bf16.mxu1 %v2915_v48  ;;  %v443_v61 = vsel %vm440_vm3, %v438_v52, %v424_v49 }
 0x536   :  { %2918 = vmatpush3.bf16.msra.mxu1 %v2915_v48  ;;  %v447_v44 = vmul.f32 %v443_v61, %v3595_v53 }
 0x538   :  { %v426_v5 = vpop.permute.xlu1 %425 }
 0x539   :  { %v444_v6 = vsel %vm440_vm3, %v439_v3, %v426_v5 }
 0x53a   :  { %v448_v45 = vmul.f32 %v444_v6, %v3598_v63  ;;  %v3132_v6 = vunpack.i.l.bf16 %v3131_v2 }
 0x53c   :  { %v2891_v13 = vpack.c.bf16 %v448_v45, %v447_v44  ;;  %v3101_v17 = vpop.permute.xlu1 %3100 }
 0x53d   :  { %v3103_v18 = vunpack.i.h.bf16 %v3101_v17  ;;  %v3102_v19 = vunpack.i.l.bf16 %v3101_v17 }
 0x53e   :  { %2892 = vmatprep.subr.bf16.mxu0 %v2891_v13 }
 0x53f   :  { %2894 = vmatpush3.bf16.msra.mxu0 %v2891_v13  ;;  %v3612_v30 = vpack.c.bf16 %v3103_v18, %v3102_v19 }
 0x540   :  { %2896 = vmatprep.subr.bf16.mxu0 %v3604_v12 }
 0x542   :  { %2625 = vmatmul.mubr.msk.f32.vlgmr.msra.gmra.mrb[2].mxu0 %vm130_vm0, %v3541_v27 }
 0x543   :  { %2898 = vmatpush3.bf16.msra.mxu0 %v3604_v12 }
 0x544   :  { %2900 = vmatprep.subr.bf16.mxu0 %v3612_v30 }
 0x547   :  { %2902 = vmatpush3.bf16.msra.mxu0 %v3612_v30 }
 0x548   :  { %2904 = vmatprep.subr.bf16.mxu0 %v3610_v20 }
 0x54b   :  { %2906 = vmatpush3.bf16.msra.mxu0 %v3610_v20 }
 0x54c   :  { %2908 = vmatprep.subr.bf16.mxu0 %v3616_v40 }
 0x54f   :  { %2910 = vmatpush3.bf16.msra.mxu0 %v3616_v40 }
 0x5a6   :  { %v3141_v62 = vpop.permute.xlu0 %3140 }
 0x5a7   :  { %v3143_v17 = vunpack.i.h.bf16 %v3141_v62  ;;  %v3142_v18 = vunpack.i.l.bf16 %v3141_v62  ;;  %v3669_v62 = vpack.i.bf16 %v3585_v4, %v3581_v1 }
 0x5a9   :  { %v2931_v19 = vpack.c.bf16 %v3143_v17, %v3142_v18  ;;  %v3671_v17 = vld [vmem:[#allocation4 + $0x70] sm:$0xff]  ;;  %v3673_v18 = vld [vmem:[#allocation4 + $0x88] sm:$0xff] }
 0x615   :  { %v2626_v27 = vpop.f32.mrb[2].mxu0 }
 0x616   :  { %v529_v41 = vmul.f32 0.35355338, %v2626_v27  ;;  %v519_v42 = vpop.f32.mrb[3].mxu0 }
 0x617   :  { %v528_v43 = vmul.f32 0.35355338, %v519_v42 }
 0x618   :  { %v531_v47 = vadd.f32 %v529_v41, %v3622_v10 }
 0x619   :  { %v530_v49 = vadd.f32 %v528_v43, %v3624_v46 }
 0x61a   :  { %v535_v48 = vsel %vm257_vm1, %v531_v47, -inf }
 0x61b   :  { %536 = vmax.xlane.f32.xlu1 %v535_v48  ;;  %v532_v50 = vsel %vm257_vm1, %v530_v49, -inf }
 0x61f   :  { %533 = vmax.xlane.f32.xlu1 %v532_v50 }
 0x630   :  { %3125 = vrot.lane.b32.xlu1 %v3124_v14, %s3341_s13  ;;  %v3133_v14 = vunpack.i.h.bf16 %v3131_v2 }
 0x634   :  { %3135 = vrot.lane.b32.xlu1 %v3134_v26, %s3342_s16 }
 0x638   :  { %876 = vrot.lane.b32.xlu1 %v3513_v60, %s3342_s16  ;;  %v2923_v60 = vpack.c.bf16 %v3133_v14, %v3132_v6 }
 0x6a8   :  { %v537_v52 = vpop.xlane.xlu1 %536 }
 0x6a9   :  { %v539_v61 = vsub.f32 %v531_v47, %v537_v52 }
 0x6ab   :  { %v542_v8 = vmul.f32 1.442695, %v539_v61 }
 0x6ac   :  { %v534_v0 = vpop.xlane.xlu1 %533 }
 0x6ad   :  { %v538_v3 = vsub.f32 %v530_v49, %v534_v0 }
 0x6af   :  { %v540_v9 = vmul.f32 1.442695, %v538_v3 }
 0x6b0   :  { %v3126_v5 = vpop.permute.xlu1 %3125 }
 0x6b1   :  { %3218 = vpow2.f32 %v540_v9  ;;  %v3128_v24 = vunpack.i.h.bf16 %v3126_v5  ;;  %v3127_v25 = vunpack.i.l.bf16 %v3126_v5 }
 0x6b2   :  { %3220 = vpow2.f32 %v542_v8 }
 0x6b3   :  { %v2919_v26 = vpack.c.bf16 %v3128_v24, %v3127_v25 }
 0x6b4   :  { %v3136_v44 = vpop.permute.xlu1 %3135 }
 0x6b5   :  { %2920 = vmatprep.subr.bf16.mxu1 %v2919_v26  ;;  %v3138_v45 = vunpack.i.h.bf16 %v3136_v44  ;;  %v3137_v13 = vunpack.i.l.bf16 %v3136_v44 }
 0x6b6   :  { %2922 = vmatpush3.bf16.msra.mxu1 %v2919_v26 }
 0x6b7   :  { %2924 = vmatprep.subr.bf16.mxu1 %v2923_v60  ;;  %v2927_v54 = vpack.c.bf16 %v3138_v45, %v3137_v13  ;;  %v124_v45 = vld [vmem:[#allocation6 + $0x28] sm:$0xff]  ;;  %v125_v13 = vld [vmem:[#allocation6 + $0x38] sm:$0xff] }
 0x6b8   :  { %v877_v50 = vpop.permute.xlu1 %876 }
 0x6b9   :  { %2928 = vmatprep.subr.bf16.mxu0 %v2927_v54 }
 0x6ba   :  { %2926 = vmatpush3.bf16.msra.mxu1 %v2923_v60 }
 0x6bb   :  { %v3219_v28 = vpop.eup %3218 }
 0x6bc   :  { %v3221_v29 = vpop.eup %3220  ;;  %2643 = vmatprep.mubr.msk.f32.mxu0 %vm257_vm1, %v3219_v28  ;;  %2662 = vmatprep.mubr.msk.f32.mxu1 %vm257_vm1, %v3219_v28  ;;  %v122_v28 = vld [vmem:[#allocation6 + $0x8] sm:$0xff] }
 0x6bd   :  { %2644 = vmatmul.mubr.msk.f32.vlgmr.msra.gmra.mrb[4].mxu0 %vm257_vm1, %v3221_v29  ;;  %2663 = vmatmul.mubr.msk.f32.vlgmr.msra.gmra.mrb[2].mxu1 %vm257_vm1, %v3221_v29  ;;  %v123_v29 = vld [vmem:[#allocation6 + $0x18] sm:$0xff] }
 0x6be   :  { %2930 = vmatpush3.bf16.msra.mxu0 %v2927_v54  ;;  %v2935_v44 = vpack.c.bf16 %v123_v29, %v122_v28  ;;  %v2939_v54 = vpack.c.bf16 %v125_v13, %v124_v45 }
 0x6bf   :  { %2932 = vmatprep.subr.bf16.mxu0 %v2931_v19 }
 0x6c2   :  { %2934 = vmatpush3.bf16.msra.mxu0 %v2931_v19  ;;  %v3683_v19 = vpack.i.bf16 %v3598_v63, %v3595_v53 }
 0x6c3   :  { %2936 = vmatprep.subr.bf16.mxu0 %v2935_v44 }
 0x790   :  { %v2645_v21 = vpop.f32.mrb[4].mxu0  ;;  %v2664_v22 = vpop.f32.mrb[2].mxu1 }
 0x791   :  { %3222 = vrcp.f32 %v2645_v21  ;;  %v656_v27 = vpop.f32.mrb[5].mxu0  ;;  %v763_v41 = vpop.f32.mrb[3].mxu1  ;;  %v3687_v21 = vld [vmem:[#allocation4 + $0xa0] sm:$0xff] }
 0x792   :  { %3224 = vrcp.f32 %v656_v27 }
 0x79b   :  { %v3223_v42 = vpop.eup %3222 }
 0x79c   :  { %v3225_v43 = vpop.eup %3224  ;;  %v775_v47 = vmul.f32 %v3223_v42, %v2664_v22  ;;  %v3689_v22 = vld [vmem:[#allocation4 + $0xb8] sm:$0xff] }
 0x79d   :  { %v773_v48 = vmul.f32 %v3225_v43, %v763_v41  ;;  %v3695_v27 = vpack.i.bf16 %v3689_v22, %v3687_v21 }
 0x79f   :  { %2673 = vmatprep.mubr.msk.f32.mxu0 %vm130_vm0, %v773_v48 }
 0x7a0   :  { %2674 = vmatmul.mubr.msk.f32.vlgmr.msra.gmra.mrb[6].mxu0 %vm130_vm0, %v775_v47 }
 0x7a1   :  { %2938 = vmatpush3.bf16.msra.mxu0 %v2935_v44 }
 0x7a2   :  { %2940 = vmatprep.subr.bf16.mxu0 %v2939_v54 }
 0x7a5   :  { %2942 = vmatpush3.bf16.msra.mxu0 %v2939_v54 }
 0x873   :  { %v2675_v49 = vpop.f32.mrb[6].mxu0 }
 0x874   :  { %v874_v51 = vadd.f32 %v2675_v49, %v3429_v11  ;;  %v864_v52 = vpop.f32.mrb[7].mxu0 }
 0x875   :  { %v873_v61 = vadd.f32 %v864_v52, %v3425_v7 }
 0x876   :  { %v3651_v0 = vadd.f32 %v877_v50, %v874_v51 }
 0x877   :  { %v3653_v2 = vadd.f32 %v877_v50, %v873_v61 }
 0x878   :  { %v884_v3 = vsel %vm130_vm0, %v3651_v0, 0.0 }
 0x879   :  { %885 = vadd.xlane.f32.xlu1 %v884_v3  ;;  %v881_v8 = vsel %vm130_vm0, %v3653_v2, 0.0 }
 0x87a   :  { %882 = vadd.xlane.f32.xlu0 %v881_v8 }
 0x88a   :  { %907 = vrot.lane.b32.xlu1 %v3440_v23, %s3341_s13 }
 0x88e   :  { %3145 = vrot.lane.b32.xlu1 %v3669_v62, %s3341_s13 }
 0x892   :  { %3150 = vrot.lane.b32.xlu1 %v3683_v19, %s3341_s13 }
 0x896   :  { %3160 = vrot.lane.b32.xlu1 %v3695_v27, %s3341_s13 }
 0x906   :  { %v886_v9 = vpop.xlane.xlu1 %885 }
 0x907   :  { %v888_v11 = vmul.f32 0.03125, %v886_v9  ;;  %v883_v14 = vpop.xlane.xlu0 %882 }
 0x908   :  { %v887_v5 = vmul.f32 0.03125, %v883_v14 }
 0x909   :  { %v890_v7 = vsub.f32 %v3651_v0, %v888_v11 }
 0x90a   :  { %v889_v6 = vsub.f32 %v3653_v2, %v887_v5  ;;  %v908_v51 = vpop.permute.xlu1 %907 }
 0x90b   :  { %v892_v26 = vmul.f32 %v890_v7, %v890_v7 }
 0x90c   :  { %v891_v24 = vmul.f32 %v889_v6, %v889_v6 }
 0x90d   :  { %v896_v60 = vsel %vm130_vm0, %v892_v26, 0.0 }
 0x90e   :  { %v893_v25 = vsel %vm130_vm0, %v891_v24, 0.0  ;;  %v2411_v24 = vld [vmem:[%s3913_s1 + $0x2] ss:$0 sm:$0xff] }
 0x90f   :  { %894 = vadd.xlane.f32.xlu0 %v893_v25  ;;  %v3146_v25 = vpop.permute.xlu1 %3145 }
 0x910   :  { %v3148_v26 = vunpack.i.h.bf16 %v3146_v25 }
 0x913   :  { %897 = vadd.xlane.f32.xlu0 %v896_v60  ;;  %v3151_v29 = vpop.permute.xlu1 %3150 }
 0x914   :  { %v3153_v45 = vunpack.i.h.bf16 %v3151_v29  ;;  %v3152_v13 = vunpack.i.l.bf16 %v3151_v29 }
 0x916   :  { %v2947_v54 = vpack.c.bf16 %v3153_v45, %v3152_v13 }
 0x929   :  { %912 = vrot.lane.b32.xlu0 %v3440_v23, %s3342_s16  ;;  %v3677_v23 = vpack.i.bf16 %v3673_v18, %v3671_v17 }
 0x92d   :  { %3155 = vrot.lane.b32.xlu0 %v3677_v23, %s3341_s13 }
 0x931   :  { %1136 = vrot.lane.b32.xlu0 %v2411_v24, %s3341_s13 }
 0x99c   :  { %v895_v41 = vpop.xlane.xlu0 %894 }
 0x99d   :  { %v899_v42 = vmul.f32 0.03125, %v895_v41 }
 0x99f   :  { %v901_v43 = vadd.f32 1e-05, %v899_v42  ;;  %v3161_v42 = vpop.permute.xlu1 %3160 }
 0x9a0   :  { %v898_v47 = vpop.xlane.xlu0 %897 }
 0x9a1   :  { %3226 = vrsqrt.f32 %v901_v43  ;;  %v900_v48 = vmul.f32 0.03125, %v898_v47  ;;  %v3163_v43 = vunpack.i.h.bf16 %v3161_v42  ;;  %v3162_v47 = vunpack.i.l.bf16 %v3161_v42 }
 0x9a3   :  { %v902_v49 = vadd.f32 1e-05, %v900_v48  ;;  %v2955_v48 = vpack.c.bf16 %v3163_v43, %v3162_v47 }
 0x9a4   :  { %v913_v61 = vpop.permute.xlu0 %912 }
 0x9a5   :  { %3228 = vrsqrt.f32 %v902_v49 }
 0x9a8   :  { %v3156_v28 = vpop.permute.xlu0 %3155 }
 0x9a9   :  { %v3157_v44 = vunpack.i.l.bf16 %v3156_v28 }
 0x9ab   :  { %v3227_v50 = vpop.eup %3226 }
 0x9ac   :  { %v905_v52 = vmul.f32 %v3227_v50, %v889_v6  ;;  %v3147_v6 = vunpack.i.l.bf16 %v3146_v25 }
 0x9ae   :  { %v910_v3 = vmul.f32 %v908_v51, %v905_v52  ;;  %v2943_v60 = vpack.c.bf16 %v3148_v26, %v3147_v6 }
 0x9af   :  { %v3229_v8 = vpop.eup %3228 }
 0x9b0   :  { %v906_v9 = vmul.f32 %v3229_v8, %v890_v7  ;;  %v915_v11 = vadd.f32 %v913_v61, %v910_v3  ;;  %v3158_v7 = vunpack.i.h.bf16 %v3156_v28  ;;  %2944 = vmatprep.subr.bf16.mxu0 %v2943_v60 }
 0x9b2   :  { %v911_v14 = vmul.f32 %v908_v51, %v906_v9  ;;  %2684 = vmatprep.mubr.msk.f32.mxu0 %vm130_vm0, %v915_v11  ;;  %v2951_v41 = vpack.c.bf16 %v3158_v7, %v3157_v44 }
 0x9b4   :  { %v916_v5 = vadd.f32 %v913_v61, %v911_v14 }
 0x9b6   :  { %2685 = vmatmul.mubr.msk.f32.vlgmr.msra.gmra.mrb[8].mxu0 %vm130_vm0, %v916_v5 }
 0x9b7   :  { %2946 = vmatpush3.bf16.msra.mxu0 %v2943_v60 }
 0x9b8   :  { %2948 = vmatprep.subr.bf16.mxu0 %v2947_v54 }
 0x9bb   :  { %2950 = vmatpush3.bf16.msra.mxu0 %v2947_v54 }
 0x9bc   :  { %2952 = vmatprep.subr.bf16.mxu0 %v2951_v41 }
 0x9bf   :  { %2954 = vmatpush3.bf16.msra.mxu0 %v2951_v41  ;;  %v1137_v41 = vpop.permute.xlu0 %1136 }
 0x9c0   :  { %2956 = vmatprep.subr.bf16.mxu0 %v2955_v48 }
 0x9c3   :  { %2958 = vmatpush3.bf16.msra.mxu0 %v2955_v48 }
 0xa89   :  { %v2686_v49 = vpop.f32.mrb[8].mxu0 }
 0xa8a   :  { %v999_v50 = vadd.f32 %v2686_v49, %v2411_v24  ;;  %v993_v51 = vpop.f32.mrb[9].mxu0 }
 0xa8b   :  { %v994_v52 = vadd.f32 %v2411_v24, %v993_v51 }
 0xa8c   :  { %v1005_v61 = vmul.f32 0.044715, %v999_v50  ;;  %v1003_v45 = vmul.f32 0.5, %v999_v50 }
 0xa8d   :  { %v1004_v3 = vmul.f32 0.044715, %v994_v52  ;;  %v1002_v7 = vmul.f32 0.5, %v994_v52 }
 0xa8e   :  { %v1007_v8 = vmul.f32 %v1005_v61, %v999_v50 }
 0xa8f   :  { %v1006_v9 = vmul.f32 %v1004_v3, %v994_v52 }
 0xa90   :  { %v1009_v11 = vmul.f32 %v1007_v8, %v999_v50 }
 0xa91   :  { %v1008_v14 = vmul.f32 %v1006_v9, %v994_v52 }
 0xa92   :  { %v1011_v5 = vadd.f32 %v1009_v11, %v999_v50 }
 0xa93   :  { %v1010_v25 = vadd.f32 %v1008_v14, %v994_v52 }
 0xa94   :  { %v1013_v26 = vmul.f32 0.7978846, %v1011_v5 }
 0xa95   :  { %v1012_v6 = vmul.f32 0.7978846, %v1010_v25  ;;  %v3721_v25 = vld [vmem:[#allocation6 + $0x40] sm:$0xff] }
 0xa96   :  { %3230 = vtanh.f32 %v1013_v26  ;;  %v3723_v26 = vld [vmem:[#allocation6 + $0x50] sm:$0xff] }
 0xa97   :  { %3232 = vtanh.f32 %v1012_v6  ;;  %v3728_v6 = vld [vmem:[%s3913_s1 + $0x3] ss:$0 sm:$0xff] }
 0xaa0   :  { %v3231_v60 = vpop.eup %3230 }
 0xaa1   :  { %v3233_v28 = vpop.eup %3232  ;;  %v1017_v29 = vadd.f32 1.0, %v3231_v60  ;;  %v2959_v60 = vpack.c.bf16 %v3723_v26, %v3721_v25 }
 0xaa2   :  { %v1016_v44 = vadd.f32 1.0, %v3233_v28  ;;  %v3734_v28 = vld [vmem:[#allocation6 + $0x60] sm:$0xff] }
 0xaa3   :  { %v1019_v24 = vmul.f32 %v1017_v29, %v1003_v45  ;;  %2960 = vmatprep.subr.bf16.mxu1 %v2959_v60  ;;  %v3736_v29 = vld [vmem:[#allocation6 + $0x70] sm:$0xff] }
 0xaa4   :  { %v1018_v13 = vmul.f32 %v1016_v44, %v1002_v7  ;;  %2962 = vmatpush3.bf16.msra.mxu1 %v2959_v60  ;;  %v2963_v7 = vpack.c.bf16 %v3736_v29, %v3734_v28 }
 0xaa6   :  { %2703 = vmatprep.mubr.msk.f32.mxu0 %vm257_vm1, %v1018_v13  ;;  %2964 = vmatprep.subr.bf16.mxu1 %v2963_v7 }
 0xaa7   :  { %2704 = vmatmul.mubr.msk.f32.vlgmr.msra.gmra.mrb[10].mxu0 %vm257_vm1, %v1019_v24 }
 0xaa8   :  { %2966 = vmatpush3.bf16.msra.mxu1 %v2963_v7 }
 0xaa9   :  { %2968 = vmatprep.subr.bf16.mxu1 %v3466_v34 }
 0xb7a   :  { %v2705_v54 = vpop.f32.mrb[10].mxu0 }
 0xb7b   :  { %v1134_v42 = vadd.f32 %v2705_v54, %v3651_v0  ;;  %v1124_v43 = vpop.f32.mrb[11].mxu0 }
 0xb7c   :  { %v1133_v47 = vadd.f32 %v1124_v43, %v3653_v2 }
 0xb7d   :  { %v3709_v48 = vadd.f32 %v1137_v41, %v1134_v42 }
 0xb7e   :  { %v3711_v49 = vadd.f32 %v1137_v41, %v1133_v47 }
 0xb7f   :  { %v1156_v50 = vsel %vm130_vm0, %v3709_v48, 0.0 }
 0xb80   :  { %1157 = vadd.xlane.f32.xlu0 %v1156_v50  ;;  %v1153_v51 = vsel %vm130_vm0, %v3711_v49, 0.0 }
 0xb81   :  { %1154 = vadd.xlane.f32.xlu1 %v1153_v51 }
 0xc0d   :  { %v1158_v52 = vpop.xlane.xlu0 %1157 }
 0xc0e   :  { %v1160_v61 = vmul.f32 0.03125, %v1158_v52  ;;  %v1155_v3 = vpop.xlane.xlu1 %1154 }
 0xc0f   :  { %v1159_v8 = vmul.f32 0.03125, %v1155_v3 }
 0xc10   :  { %v1162_v0 = vsub.f32 %v3709_v48, %v1160_v61 }
 0xc11   :  { %v1161_v2 = vsub.f32 %v3711_v49, %v1159_v8 }
 0xc12   :  { %v1164_v9 = vmul.f32 %v1162_v0, %v1162_v0 }
 0xc13   :  { %v1163_v11 = vmul.f32 %v1161_v2, %v1161_v2 }
 0xc14   :  { %v1168_v14 = vsel %vm130_vm0, %v1164_v9, 0.0 }
 0xc15   :  { %1169 = vadd.xlane.f32.xlu1 %v1168_v14  ;;  %v1165_v5 = vsel %vm130_vm0, %v1163_v11, 0.0 }
 0xc16   :  { %1166 = vadd.xlane.f32.xlu0 %v1165_v5 }
 0xc2c   :  { %1186 = vrot.lane.b32.xlu0 %v3728_v6, %s3340_s10 }
 0xca2   :  { %v1170_v44 = vpop.xlane.xlu1 %1169 }
 0xca3   :  { %v1172_v45 = vmul.f32 0.03125, %v1170_v44  ;;  %v1167_v13 = vpop.xlane.xlu0 %1166 }
 0xca4   :  { %v1171_v24 = vmul.f32 0.03125, %v1167_v13 }
 0xca5   :  { %v1174_v54 = vadd.f32 1e-05, %v1172_v45 }
 0xca6   :  { %v1173_v41 = vadd.f32 1e-05, %v1171_v24 }
 0xca7   :  { %3234 = vrsqrt.f32 %v1174_v54  ;;  %v1187_v51 = vpop.permute.xlu0 %1186 }
 0xca8   :  { %3236 = vrsqrt.f32 %v1173_v41 }
 0xcb1   :  { %v3235_v42 = vpop.eup %3234 }
 0xcb2   :  { %v3237_v43 = vpop.eup %3236  ;;  %v1178_v47 = vmul.f32 %v3235_v42, %v1162_v0  ;;  %v3755_v0 = vld [vmem:[%s3913_s1 + $0x4] ss:$0 sm:$0xff] }
 0xcb3   :  { %v1177_v50 = vmul.f32 %v3237_v43, %v1161_v2 }
 0xcb4   :  { %v1184_v52 = vmul.f32 %v3728_v6, %v1178_v47 }
 0xcb5   :  { %v1183_v61 = vmul.f32 %v3728_v6, %v1177_v50 }
 0xcb6   :  { %v1190_v8 = vadd.f32 %v1187_v51, %v1184_v52 }
 0xcb7   :  { %v1189_v3 = vadd.f32 %v1187_v51, %v1183_v61 }
 0xcb9   :  { %2714 = vmatprep.mubr.msk.f32.mxu1 %vm130_vm0, %v1189_v3 }
 0xcba   :  { %2715 = vmatmul.mubr.msk.f32.vlgmr.msra.gmra.mrb[4].mxu1 %vm130_vm0, %v1190_v8 }
 0xcbb   :  { %2970 = vmatpush3.bf16.msra.mxu1 %v3466_v34 }
 0xcbc   :  { %2972 = vmatprep.subr.bf16.mxu1 %v3472_v36 }
 0xcbf   :  { %2974 = vmatpush3.bf16.msra.mxu1 %v3472_v36 }
 0xcc0   :  { %2976 = vmatprep.subr.bf16.mxu1 %v3483_v39 }
 0xcc3   :  { %2978 = vmatpush3.bf16.msra.mxu1 %v3483_v39 }
 0xcc4   :  { %2980 = vmatprep.subr.bf16.mxu1 %v3498_v57 }
 0xcc7   :  { %2982 = vmatpush3.bf16.msra.mxu1 %v3498_v57 }
 0xd8d   :  { %v2716_v2 = vpop.f32.mrb[4].mxu1 }
 0xd8e   :  { %v1273_v34 = vadd.f32 %v2716_v2, %v3755_v0  ;;  %v1267_v9 = vpop.f32.mrb[5].mxu1 }
 0xd8f   :  { %v1268_v11 = vadd.f32 %v3755_v0, %v1267_v9 }
 0xd90   :  { %v1555_v36 = vmul.f32 %v1273_v34, %v3460_v32  ;;  %v1559_v14 = vmul.f32 %v1273_v34, %v3476_v38  ;;  %v1561_v39 = vmul.f32 %v1273_v34, %v3494_v56  ;;  %v3771_v44 = vmul.f32 %v1273_v34, %v3468_v35 }
 0xd91   :  { %2733 = vmatprep.mubr.msk.f32.mxu1 %vm257_vm1, %v1268_v11  ;;  %v1554_v57 = vmul.f32 %v1268_v11, %v3458_v31  ;;  %v1558_v5 = vmul.f32 %v1268_v11, %v3474_v37  ;;  %v1560_v60 = vmul.f32 %v1268_v11, %v3492_v55  ;;  %v3768_v7 = vmul.f32 %v1268_v11, %v3462_v33 }
 0xd92   :  { %2734 = vmatmul.mubr.msk.f32.vlgmr.msra.gmra.mrb[6].mxu1 %vm257_vm1, %v1273_v34  ;;  %v1277_v31 = vmul.f32 %v1273_v34, %v3506_v59  ;;  %v1276_v24 = vmul.f32 %v1268_v11, %v3502_v58 }
 0xd93   :  { %v3164_v32 = vpack.i.bf16 %v1555_v36, %v1554_v57  ;;  %v3174_v38 = vpack.i.bf16 %v1559_v14, %v1558_v5  ;;  %v3179_v45 = vpack.i.bf16 %v1561_v39, %v1560_v60  ;;  %v3169_v56 = vpack.i.bf16 %v3771_v44, %v3768_v7 }
 0xe65   :  { %v2735_v13 = vpop.f32.mrb[6].mxu1 }
 0xe66   :  { %v1360_v37 = vmul.f32 %v2735_v13, %v3535_v16  ;;  %v1350_v55 = vpop.f32.mrb[7].mxu1 }
 0xe67   :  { %v1359_v33 = vmul.f32 %v1350_v55, %v3533_v15 }
 0xe68   :  { %v3779_v54 = vadd.f32 %v1360_v37, %v1277_v31 }
 0xe69   :  { %v1361_v35 = vadd.f32 %v1359_v33, %v1276_v24 }
 0xe6b   :  { %1365 = vrot.lane.b32.xlu1 %v1361_v35, %s3340_s10  ;;  %2744 = vmatprep.mubr.msk.f32.mxu0 %vm130_vm0, %v1361_v35 }
 0xe6f   :  { %1367 = vrot.lane.b32.xlu1 %v3779_v54, %s3340_s10 }
 0xedd   :  { %v1366_v41 = vpop.permute.xlu1 %1365 }
 0xede   :  { %1371 = vxpose.xlu0.b32.start [1/2] (short) (narrow) %v1366_v41, 32 }
 0xee1   :  { %v1368_v59 = vpop.permute.xlu1 %1367 }
 0xee2   :  { %1372 = vxpose.xlu0.b32.end [2/2] (short) (narrow) %v1368_v59, 32 }
 0xf5e   :  { %v1387_v16 = vpop.trf.xlu0 }
 0xf5f   :  { %1407 = vrot.lane.b32.xlu1 %v1387_v16, %s3337_s17 }
 0xf62   :  { %v1388_v58 = vpop.trf.xlu0 }
 0xf63   :  { %1419 = vrot.lane.b32.xlu1 %v1387_v16, %s3342_s16 }
 0xf66   :  { %v1389_v15 = vpop.trf.xlu0 }
 0xf67   :  { %1431 = vrot.lane.b32.xlu1 %v1387_v16, %s3343_s3  ;;  %1423 = vrot.lane.b32.xlu0 %v1389_v15, %s3342_s16 }
 0xf6a   :  { %v1390_v42 = vpop.trf.xlu0 }
 0xf6b   :  { %1409 = vrot.lane.b32.xlu1 %v1388_v58, %s3337_s17  ;;  %3165 = vrot.lane.b32.xlu0 %v3164_v32, %s3341_s13 }
 0xf6f   :  { %1421 = vrot.lane.b32.xlu1 %v1388_v58, %s3342_s16  ;;  %3175 = vrot.lane.b32.xlu0 %v3174_v38, %s3341_s13 }
 0xf73   :  { %1433 = vrot.lane.b32.xlu1 %v1388_v58, %s3343_s3  ;;  %3180 = vrot.lane.b32.xlu0 %v3179_v45, %s3341_s13 }
 0xf77   :  { %1411 = vrot.lane.b32.xlu1 %v1389_v15, %s3337_s17 }
 0xf7b   :  { %1435 = vrot.lane.b32.xlu1 %v1389_v15, %s3343_s3 }
 0xf7f   :  { %1413 = vrot.lane.b32.xlu1 %v1390_v42, %s3337_s17 }
 0xf83   :  { %1425 = vrot.lane.b32.xlu1 %v1390_v42, %s3342_s16 }
 0xf87   :  { %1437 = vrot.lane.b32.xlu1 %v1390_v42, %s3343_s3 }
 0xfd1   :  { %v1408_v43 = vpop.permute.xlu1 %1407 }
 0xfd2   :  { %v1443_v9 = vsel %vm431_vm2, %v1387_v16, %v1408_v43 }
 0xfd5   :  { %v1420_v47 = vpop.permute.xlu1 %1419 }
 0xfd6   :  { %v1447_v11 = vsel %vm130_vm0, %v1443_v9, %v1420_v47 }
 0xfd9   :  { %v1432_v50 = vpop.permute.xlu1 %1431  ;;  %v1424_v51 = vpop.permute.xlu0 %1423 }
 0xfda   :  { %v1451_v36 = vsel %vm440_vm3, %v1447_v11, %v1432_v50 }
 0xfdb   :  { %v1455_v60 = vmul.f32 %v1451_v36, %v3581_v1 }
 0xfdd   :  { %v1410_v52 = vpop.permute.xlu1 %1409  ;;  %v3166_v61 = vpop.permute.xlu0 %3165 }
 0xfde   :  { %v3168_v3 = vunpack.i.h.bf16 %v3166_v61  ;;  %v3167_v8 = vunpack.i.l.bf16 %v3166_v61  ;;  %v1444_v14 = vsel %vm431_vm2, %v1388_v58, %v1410_v52 }
 0xfe0   :  { %v3007_v2 = vpack.c.bf16 %v3168_v3, %v3167_v8 }
 0xfe1   :  { %v1422_v34 = vpop.permute.xlu1 %1421  ;;  %v3176_v47 = vpop.permute.xlu0 %3175 }
 0xfe2   :  { %3008 = vmatprep.subr.bf16.mxu1 %v3007_v2  ;;  %v1448_v39 = vsel %vm130_vm0, %v1444_v14, %v1422_v34 }
 0xfe3   :  { %3010 = vmatpush3.bf16.msra.mxu1 %v3007_v2 }
 0xfe5   :  { %v1434_v57 = vpop.permute.xlu1 %1433  ;;  %v3181_v3 = vpop.permute.xlu0 %3180 }
 0xfe6   :  { %v1452_v5 = vsel %vm440_vm3, %v1448_v39, %v1434_v57  ;;  %v3183_v8 = vunpack.i.h.bf16 %v3181_v3  ;;  %v3182_v2 = vunpack.i.l.bf16 %v3181_v3 }
 0xfe7   :  { %v1456_v32 = vmul.f32 %v1452_v5, %v3585_v4 }
 0xfe9   :  { %v1412_v38 = vpop.permute.xlu1 %1411  ;;  %v2983_v45 = vpack.c.bf16 %v1456_v32, %v1455_v60 }
 0xfea   :  { %v1445_v37 = vsel %vm431_vm2, %v1389_v15, %v1412_v38 }
 0xfeb   :  { %2984 = vmatprep.subr.bf16.mxu0 %v2983_v45  ;;  %v1449_v24 = vsel %vm130_vm0, %v1445_v37, %v1424_v51 }
 0xfec   :  { %2986 = vmatpush3.bf16.msra.mxu0 %v2983_v45 }
 0xfed   :  { %v1436_v13 = vpop.permute.xlu1 %1435 }
 0xfee   :  { %v1453_v33 = vsel %vm440_vm3, %v1449_v24, %v1436_v13 }
 0xfef   :  { %v1457_v59 = vmul.f32 %v1453_v33, %v3595_v53 }
 0xff1   :  { %v1414_v31 = vpop.permute.xlu1 %1413 }
 0xff2   :  { %v1446_v35 = vsel %vm431_vm2, %v1390_v42, %v1414_v31 }
 0xff5   :  { %v1426_v55 = vpop.permute.xlu1 %1425 }
 0xff6   :  { %v1450_v41 = vsel %vm130_vm0, %v1446_v35, %v1426_v55 }
 0xff9   :  { %v1438_v1 = vpop.permute.xlu1 %1437 }
 0xffa   :  { %v1454_v4 = vsel %vm440_vm3, %v1450_v41, %v1438_v1 }
 0xffb   :  { %v1458_v16 = vmul.f32 %v1454_v4, %v3598_v63 }
 0xffd   :  { %v2987_v58 = vpack.c.bf16 %v1458_v16, %v1457_v59 }
 0xfff   :  { %2988 = vmatprep.subr.bf16.mxu0 %v2987_v58 }
0x1000   :  { %2990 = vmatpush3.bf16.msra.mxu0 %v2987_v58 }
0x1001   :  { %2992 = vmatprep.subr.bf16.mxu0 %v3604_v12 }
0x1003   :  { %2745 = vmatmul.mubr.msk.f32.vlgmr.msra.gmra.mrb[12].mxu0 %vm130_vm0, %v3779_v54 }
0x1004   :  { %2994 = vmatpush3.bf16.msra.mxu0 %v3604_v12 }
0x1005   :  { %2996 = vmatprep.subr.bf16.mxu0 %v3612_v30 }
0x1008   :  { %2998 = vmatpush3.bf16.msra.mxu0 %v3612_v30 }
0x1009   :  { %3000 = vmatprep.subr.bf16.mxu0 %v3610_v20 }
0x100c   :  { %3002 = vmatpush3.bf16.msra.mxu0 %v3610_v20  ;;  %v3184_v20 = vpack.i.bf16 %v3723_v26, %v3721_v25  ;;  %v3177_v25 = vunpack.i.l.bf16 %v3176_v47 }
0x100d   :  { %3004 = vmatprep.subr.bf16.mxu0 %v3616_v40 }
0x100e   :  { %3185 = vrot.lane.b32.xlu0 %v3184_v20, %s3342_s16 }
0x1010   :  { %3006 = vmatpush3.bf16.msra.mxu0 %v3616_v40  ;;  %v3189_v40 = vpack.i.bf16 %v3736_v29, %v3734_v28 }
0x1012   :  { %3190 = vrot.lane.b32.xlu0 %v3189_v40, %s3342_s16 }
0x1016   :  { %1854 = vrot.lane.b32.xlu0 %v3755_v0, %s3342_s16  ;;  %v3019_v0 = vpack.c.bf16 %v3183_v8, %v3182_v2 }
0x1080   :  { %v3186_v11 = vpop.permute.xlu0 %3185 }
0x1081   :  { %v3188_v36 = vunpack.i.h.bf16 %v3186_v11  ;;  %v3187_v14 = vunpack.i.l.bf16 %v3186_v11 }
0x1083   :  { %v3023_v39 = vpack.c.bf16 %v3188_v36, %v3187_v14 }
0x1084   :  { %v3191_v57 = vpop.permute.xlu0 %3190 }
0x1085   :  { %3024 = vmatprep.subr.bf16.mxu0 %v3023_v39  ;;  %v3193_v5 = vunpack.i.h.bf16 %v3191_v57  ;;  %v3192_v60 = vunpack.i.l.bf16 %v3191_v57 }
0x1087   :  { %v3027_v32 = vpack.c.bf16 %v3193_v5, %v3192_v60 }
0x1088   :  { %v1855_v41 = vpop.permute.xlu0 %1854 }
0x10d6   :  { %v2746_v53 = vpop.f32.mrb[12].mxu0 }
0x10d7   :  { %v1539_v63 = vmul.f32 0.35355338, %v2746_v53  ;;  %v1529_v15 = vpop.f32.mrb[13].mxu0 }
0x10d8   :  { %v1538_v42 = vmul.f32 0.35355338, %v1529_v15 }
0x10d9   :  { %v1541_v54 = vadd.f32 %v1539_v63, %v3622_v10 }
0x10da   :  { %v1540_v43 = vadd.f32 %v1538_v42, %v3624_v46 }
0x10db   :  { %v1545_v12 = vsel %vm257_vm1, %v1541_v54, -inf }
0x10dc   :  { %1546 = vmax.xlane.f32.xlu1 %v1545_v12  ;;  %v1542_v30 = vsel %vm257_vm1, %v1540_v43, -inf }
0x10e0   :  { %1543 = vmax.xlane.f32.xlu1 %v1542_v30 }
0x10f1   :  { %3170 = vrot.lane.b32.xlu1 %v3169_v56, %s3341_s13  ;;  %v3178_v56 = vunpack.i.h.bf16 %v3176_v47 }
0x10f3   :  { %v3015_v29 = vpack.c.bf16 %v3178_v56, %v3177_v25 }
0x1169   :  { %v1547_v10 = vpop.xlane.xlu1 %1546 }
0x116a   :  { %v1549_v46 = vsub.f32 %v1541_v54, %v1547_v10  ;;  %v1149_v10 = vld [vmem:[#allocation6 + $0x48] sm:$0xff] }
0x116c   :  { %v1552_v7 = vmul.f32 1.442695, %v1549_v46  ;;  %v1150_v46 = vld [vmem:[#allocation6 + $0x58] sm:$0xff] }
0x116d   :  { %v1544_v50 = vpop.xlane.xlu1 %1543  ;;  %v3031_v47 = vpack.c.bf16 %v1150_v46, %v1149_v10 }
0x116e   :  { %v1548_v51 = vsub.f32 %v1540_v43, %v1544_v50  ;;  %v1151_v50 = vld [vmem:[#allocation6 + $0x68] sm:$0xff] }
0x1170   :  { %v1550_v44 = vmul.f32 1.442695, %v1548_v51  ;;  %v1152_v51 = vld [vmem:[#allocation6 + $0x78] sm:$0xff] }
0x1171   :  { %v3171_v52 = vpop.permute.xlu1 %3170 }
0x1172   :  { %3238 = vpow2.f32 %v1550_v44  ;;  %v3173_v26 = vunpack.i.h.bf16 %v3171_v52  ;;  %v3172_v61 = vunpack.i.l.bf16 %v3171_v52 }
0x1173   :  { %3240 = vpow2.f32 %v1552_v7  ;;  %v3035_v7 = vpack.c.bf16 %v1152_v51, %v1151_v50 }
0x1174   :  { %v3011_v28 = vpack.c.bf16 %v3173_v26, %v3172_v61 }
0x1176   :  { %3012 = vmatprep.subr.bf16.mxu1 %v3011_v28 }
0x1177   :  { %3014 = vmatpush3.bf16.msra.mxu1 %v3011_v28 }
0x1178   :  { %3016 = vmatprep.subr.bf16.mxu1 %v3015_v29 }
0x117b   :  { %3018 = vmatpush3.bf16.msra.mxu1 %v3015_v29 }
0x117c   :  { %v3239_v34 = vpop.eup %3238  ;;  %3020 = vmatprep.subr.bf16.mxu1 %v3019_v0 }
0x117d   :  { %v3241_v9 = vpop.eup %3240  ;;  %2763 = vmatprep.mubr.msk.f32.mxu0 %vm257_vm1, %v3239_v34  ;;  %2782 = vmatprep.mubr.msk.f32.mxu1 %vm257_vm1, %v3239_v34 }
0x117e   :  { %2764 = vmatmul.mubr.msk.f32.vlgmr.msra.gmra.mrb[14].mxu0 %vm257_vm1, %v3241_v9 }
0x117f   :  { %3022 = vmatpush3.bf16.msra.mxu1 %v3019_v0  ;;  %3026 = vmatpush3.bf16.msra.mxu0 %v3023_v39 }
0x1180   :  { %3028 = vmatprep.subr.bf16.mxu0 %v3027_v32  ;;  %3032 = vmatprep.subr.bf16.mxu1 %v3031_v47 }
0x1182   :  { %2783 = vmatmul.mubr.msk.f32.vlgmr.msra.gmra.mrb[8].mxu1 %vm257_vm1, %v3241_v9 }
0x1183   :  { %3030 = vmatpush3.bf16.msra.mxu0 %v3027_v32  ;;  %3034 = vmatpush3.bf16.msra.mxu1 %v3031_v47 }
0x1184   :  { %3036 = vmatprep.subr.bf16.mxu1 %v3035_v7 }
0x1187   :  { %3038 = vmatpush3.bf16.msra.mxu1 %v3035_v7 }
0x1251   :  { %v2765_v38 = vpop.f32.mrb[14].mxu0 }
0x1252   :  { %3242 = vrcp.f32 %v2765_v38  ;;  %v1634_v45 = vpop.f32.mrb[15].mxu0 }
0x1253   :  { %3244 = vrcp.f32 %v1634_v45 }
0x1255   :  { %v2784_v13 = vpop.f32.mrb[8].mxu1 }
0x1256   :  { %v1741_v31 = vpop.f32.mrb[9].mxu1 }
0x125c   :  { %v3243_v37 = vpop.eup %3242 }
0x125d   :  { %v3245_v55 = vpop.eup %3244  ;;  %v1753_v24 = vmul.f32 %v3243_v37, %v2784_v13 }
0x125e   :  { %v1751_v33 = vmul.f32 %v3245_v55, %v1741_v31 }
0x1260   :  { %2793 = vmatprep.mubr.msk.f32.mxu0 %vm130_vm0, %v1751_v33 }
0x1261   :  { %2794 = vmatmul.mubr.msk.f32.vlgmr.msra.gmra.mrb[16].mxu0 %vm130_vm0, %v1753_v24 }
0x1334   :  { %v2795_v35 = vpop.f32.mrb[16].mxu0 }
0x1335   :  { %v1852_v1 = vadd.f32 %v2795_v35, %v3709_v48  ;;  %v1842_v4 = vpop.f32.mrb[17].mxu0 }
0x1336   :  { %v1851_v59 = vadd.f32 %v1842_v4, %v3711_v49 }
0x1337   :  { %v3850_v16 = vadd.f32 %v1855_v41, %v1852_v1 }
0x1338   :  { %v3852_v58 = vadd.f32 %v1855_v41, %v1851_v59 }
0x1339   :  { %v1862_v53 = vsel %vm130_vm0, %v3850_v16, 0.0 }
0x133a   :  { %1863 = vadd.xlane.f32.xlu0 %v1862_v53  ;;  %v1859_v63 = vsel %vm130_vm0, %v3852_v58, 0.0 }
0x133b   :  { %1860 = vadd.xlane.f32.xlu1 %v1859_v63 }
0x13c7   :  { %v1864_v15 = vpop.xlane.xlu0 %1863 }
0x13c8   :  { %v1866_v42 = vmul.f32 0.03125, %v1864_v15  ;;  %v1861_v54 = vpop.xlane.xlu1 %1860 }
0x13c9   :  { %v1865_v12 = vmul.f32 0.03125, %v1861_v54 }
0x13ca   :  { %v1868_v48 = vsub.f32 %v3850_v16, %v1866_v42 }
0x13cb   :  { %v1867_v49 = vsub.f32 %v3852_v58, %v1865_v12 }
0x13cc   :  { %v1870_v43 = vmul.f32 %v1868_v48, %v1868_v48 }
0x13cd   :  { %v1869_v30 = vmul.f32 %v1867_v49, %v1867_v49 }
0x13ce   :  { %v1874_v20 = vsel %vm130_vm0, %v1870_v43, 0.0 }
0x13cf   :  { %1875 = vadd.xlane.f32.xlu1 %v1874_v20  ;;  %v1871_v40 = vsel %vm130_vm0, %v1869_v30, 0.0 }
0x13d0   :  { %1872 = vadd.xlane.f32.xlu0 %v1871_v40 }
0x13e0   :  { %1890 = vrot.lane.b32.xlu1 %v3728_v6, %s3342_s16 }
0x13e4   :  { %3195 = vrot.lane.b32.xlu1 %v3669_v62, %s3342_s16 }
0x13e6   :  { %1885 = vrot.lane.b32.xlu0 %v3728_v6, %s3341_s13 }
0x13e8   :  { %3205 = vrot.lane.b32.xlu1 %v3677_v23, %s3342_s16 }
0x13ea   :  { %3200 = vrot.lane.b32.xlu0 %v3683_v19, %s3342_s16 }
0x13ee   :  { %3210 = vrot.lane.b32.xlu0 %v3695_v27, %s3342_s16  ;;  %v2430_v27 = vld [vmem:[%s3913_s1 + $0x5] ss:$0 sm:$0xff] }
0x13ef   :  { %2106 = vrot.lane.b32.xlu1 %v2430_v27, %s3341_s13 }
0x145c   :  { %v1876_v62 = vpop.xlane.xlu1 %1875 }
0x145d   :  { %v1878_v44 = vmul.f32 0.03125, %v1876_v62  ;;  %v1873_v56 = vpop.xlane.xlu0 %1872 }
0x145e   :  { %v1877_v52 = vmul.f32 0.03125, %v1873_v56 }
0x145f   :  { %v1880_v6 = vadd.f32 1e-05, %v1878_v44 }
0x1460   :  { %v1879_v25 = vadd.f32 1e-05, %v1877_v52  ;;  %v1891_v8 = vpop.permute.xlu1 %1890 }
0x1461   :  { %3246 = vrsqrt.f32 %v1880_v6  ;;  %v1886_v26 = vpop.permute.xlu0 %1885 }
0x1462   :  { %3248 = vrsqrt.f32 %v1879_v25 }
0x1464   :  { %v3196_v34 = vpop.permute.xlu1 %3195 }
0x1465   :  { %v3198_v9 = vunpack.i.h.bf16 %v3196_v34  ;;  %v3197_v11 = vunpack.i.l.bf16 %v3196_v34  ;;  %v3201_v14 = vpop.permute.xlu0 %3200  ;;  %v3261_v34 = vld [vmem:[#allocation4] sm:$0xff] }
0x1466   :  { %v3203_v39 = vunpack.i.h.bf16 %v3201_v14  ;;  %v3202_v57 = vunpack.i.l.bf16 %v3201_v14 }
0x1467   :  { %v3039_v36 = vpack.c.bf16 %v3198_v9, %v3197_v11  ;;  %v3055_v9 = vpack.c.bf16 %v3673_v18, %v3671_v17  ;;  %v3059_v11 = vpack.c.bf16 %v3689_v22, %v3687_v21  ;;  %v3344_v22 = vmov 0.0|0.0  }
0x1468   :  { %v3206_v5 = vpop.permute.xlu1 %3205  ;;  %v3043_v38 = vpack.c.bf16 %v3203_v39, %v3202_v57 }
0x1469   :  { %3040 = vmatprep.subr.bf16.mxu0 %v3039_v36  ;;  %v3208_v60 = vunpack.i.h.bf16 %v3206_v5  ;;  %v3207_v32 = vunpack.i.l.bf16 %v3206_v5  ;;  %v3211_v13 = vpop.permute.xlu0 %3210  ;;  %3056 = vmatprep.subr.bf16.mxu1 %v3055_v9 }
0x146a   :  { %3042 = vmatpush3.bf16.msra.mxu0 %v3039_v36  ;;  %v3213_v31 = vunpack.i.h.bf16 %v3211_v13  ;;  %v3212_v37 = vunpack.i.l.bf16 %v3211_v13 }
0x146b   :  { %v3247_v19 = vpop.eup %3246  ;;  %v3047_v45 = vpack.c.bf16 %v3208_v60, %v3207_v32  ;;  %3044 = vmatprep.subr.bf16.mxu0 %v3043_v38 }
0x146c   :  { %v3249_v61 = vpop.eup %3248  ;;  %v1884_v3 = vmul.f32 %v3247_v19, %v1868_v48  ;;  %v3051_v55 = vpack.c.bf16 %v3213_v31, %v3212_v37  ;;  %v2107_v51 = vpop.permute.xlu1 %2106  ;;  %v3258_v19 = vld [vmem:[%s3913_s1 + $0x6] ss:$0 sm:$0xff] }
0x146d   :  { %v1883_v28 = vmul.f32 %v3249_v61, %v1867_v49 }
0x146e   :  { %v1889_v29 = vmul.f32 %v1886_v26, %v1884_v3  ;;  %3046 = vmatpush3.bf16.msra.mxu0 %v3043_v38 }
0x146f   :  { %v1888_v2 = vmul.f32 %v1886_v26, %v1883_v28  ;;  %3048 = vmatprep.subr.bf16.mxu0 %v3047_v45  ;;  %v3259_v26 = vld [vmem:[#allocation2 + $0x8] sm:$0xff] }
0x1470   :  { %v1894_v0 = vadd.f32 %v1891_v8, %v1889_v29 }
0x1471   :  { %v1893_v23 = vadd.f32 %v1891_v8, %v1888_v2 }
0x1472   :  { %3050 = vmatpush3.bf16.msra.mxu0 %v3047_v45 }
0x1473   :  { %2804 = vmatprep.mubr.msk.f32.mxu1 %vm130_vm0, %v1893_v23  ;;  %3052 = vmatprep.subr.bf16.mxu0 %v3051_v55 }
0x1474   :  { %2805 = vmatmul.mubr.msk.f32.vlgmr.msra.gmra.mrb[10].mxu1 %vm130_vm0, %v1894_v0 }
0x1475   :  { %3058 = vmatpush3.bf16.msra.mxu1 %v3055_v9 }
0x1476   :  { %3054 = vmatpush3.bf16.msra.mxu0 %v3051_v55  ;;  %3060 = vmatprep.subr.bf16.mxu1 %v3059_v11 }
0x1479   :  { %3062 = vmatpush3.bf16.msra.mxu1 %v3059_v11 }
0x147a   :  { %3063 = vmatprep.subr.bf16.mxu1 %v3344_v22 }
0x1547   :  { %v2806_v24 = vpop.f32.mrb[10].mxu1 }
0x1548   :  { %v1977_v33 = vadd.f32 %v2806_v24, %v2430_v27  ;;  %v1971_v35 = vpop.f32.mrb[11].mxu1  ;;  %v3346_v24 = vmov 0.0  }
0x1549   :  { %v1972_v41 = vadd.f32 %v2430_v27, %v1971_v35 }
0x154a   :  { %v1983_v1 = vmul.f32 0.044715, %v1977_v33  ;;  %v1981_v10 = vmul.f32 0.5, %v1977_v33 }
0x154b   :  { %v1982_v4 = vmul.f32 0.044715, %v1972_v41  ;;  %v1980_v20 = vmul.f32 0.5, %v1972_v41 }
0x154c   :  { %v1985_v59 = vmul.f32 %v1983_v1, %v1977_v33 }
0x154d   :  { %v1984_v53 = vmul.f32 %v1982_v4, %v1972_v41 }
0x154e   :  { %v1987_v63 = vmul.f32 %v1985_v59, %v1977_v33 }
0x154f   :  { %v1986_v15 = vmul.f32 %v1984_v53, %v1972_v41  ;;  %v73_v53 = vld [vmem:[#allocation4 + $0x8] sm:$0xff] }
0x1550   :  { %v1989_v42 = vadd.f32 %v1987_v63, %v1977_v33  ;;  %v74_v63 = vld [vmem:[#allocation4 + $0x20] sm:$0xff] }
0x1551   :  { %v1988_v54 = vadd.f32 %v1986_v15, %v1972_v41 }
0x1552   :  { %v1991_v12 = vmul.f32 0.7978846, %v1989_v42 }
0x1553   :  { %v1990_v48 = vmul.f32 0.7978846, %v1988_v54  ;;  %v3067_v54 = vpack.c.bf16 %v74_v63, %v73_v53 }
0x1554   :  { %3250 = vtanh.f32 %v1991_v12  ;;  %v75_v12 = vld [vmem:[#allocation4 + $0x38] sm:$0xff] }
0x1555   :  { %3252 = vtanh.f32 %v1990_v48  ;;  %v76_v48 = vld [vmem:[#allocation4 + $0x50] sm:$0xff] }
0x155e   :  { %v3251_v49 = vpop.eup %3250 }
0x155f   :  { %v3253_v43 = vpop.eup %3252  ;;  %v1995_v30 = vadd.f32 1.0, %v3251_v49  ;;  %v3070_v49 = vpack.c.bf16 %v76_v48, %v75_v12 }
0x1560   :  { %v1994_v40 = vadd.f32 1.0, %v3253_v43  ;;  %v77_v43 = vld [vmem:[#allocation4 + $0x68] sm:$0xff] }
0x1561   :  { %v1997_v47 = vmul.f32 %v1995_v30, %v1981_v10  ;;  %v78_v30 = vld [vmem:[#allocation4 + $0x80] sm:$0xff]  ;;  %v80_v10 = vld [vmem:[#allocation4 + $0xb0] sm:$0xff] }
0x1562   :  { %v1996_v46 = vmul.f32 %v1994_v40, %v1980_v20  ;;  %v3073_v20 = vpack.c.bf16 %v78_v30, %v77_v43  ;;  %v79_v40 = vld [vmem:[#allocation4 + $0x98] sm:$0xff] }
0x1564   :  { %2823 = vmatprep.mubr.msk.f32.mxu0 %vm257_vm1, %v1996_v46  ;;  %v3076_v46 = vpack.c.bf16 %v80_v10, %v79_v40 }
0x1565   :  { %2824 = vmatmul.mubr.msk.f32.vlgmr.msra.gmra.mrb[18].mxu0 %vm257_vm1, %v1997_v47 }
0x1638   :  { %v2825_v50 = vpop.f32.mrb[18].mxu0 }
0x1639   :  { %v2104_v7 = vadd.f32 %v2825_v50, %v3850_v16  ;;  %v2094_v62 = vpop.f32.mrb[19].mxu0  ;;  %v3260_v16 = vld [vmem:[#allocation2 + $0x18] sm:$0xff] }
0x163a   :  { %v2103_v44 = vadd.f32 %v2094_v62, %v3852_v58 }
0x163b   :  { %v2110_v56 = vadd.f32 %v2107_v51, %v2104_v7 }
0x163c   :  { %v2109_v52 = vadd.f32 %v2107_v51, %v2103_v44  ;;  %v2438_v51 = vld [vmem:[%s3913_s1 + $0x7] ss:$0 sm:$0xff] }
0x163d   :  { %v2114_v6 = vsel %vm130_vm0, %v2110_v56, 0.0 }
0x163e   :  { %2115 = vadd.xlane.f32.xlu1 %v2114_v6  ;;  %v2111_v25 = vsel %vm130_vm0, %v2109_v52, 0.0 }
0x163f   :  { %2112 = vadd.xlane.f32.xlu0 %v2111_v25 }
0x164f   :  { %2137 = vrot.lane.b32.xlu1 %v3258_v19, %s3341_s13 }
0x1653   :  { %2230 = vrot.lane.b32.xlu1 %v3259_v26, %s3341_s13 }
0x1657   :  { %2232 = vrot.lane.b32.xlu1 %v3260_v16, %s3341_s13 }
0x16cb   :  { %v2116_v58 = vpop.xlane.xlu1 %2115 }
0x16cc   :  { %v2118_v61 = vmul.f32 0.03125, %v2116_v58  ;;  %v2113_v3 = vpop.xlane.xlu0 %2112 }
0x16cd   :  { %v2117_v28 = vmul.f32 0.03125, %v2113_v3 }
0x16ce   :  { %v2120_v29 = vsub.f32 %v2110_v56, %v2118_v61 }
0x16cf   :  { %v2119_v8 = vsub.f32 %v2109_v52, %v2117_v28  ;;  %v2138_v38 = vpop.permute.xlu1 %2137 }
0x16d0   :  { %v2122_v0 = vmul.f32 %v2120_v29, %v2120_v29 }
0x16d1   :  { %v2121_v2 = vmul.f32 %v2119_v8, %v2119_v8 }
0x16d2   :  { %v2126_v27 = vsel %vm130_vm0, %v2122_v0, 0.0 }
0x16d3   :  { %v2123_v23 = vsel %vm130_vm0, %v2121_v2, 0.0  ;;  %v2231_v33 = vpop.permute.xlu1 %2230 }
0x16d4   :  { %2124 = vadd.xlane.f32.xlu0 %v2123_v23 }
0x16d7   :  { %v2233_v35 = vpop.permute.xlu1 %2232 }
0x16d8   :  { %2127 = vadd.xlane.f32.xlu0 %v2126_v27 }
0x16ee   :  { %2142 = vrot.lane.b32.xlu0 %v3258_v19, %s3342_s16 }
0x16f2   :  { %2238 = vrot.lane.b32.xlu0 %v3261_v34, %s3342_s16 }
0x1761   :  { %v2125_v36 = vpop.xlane.xlu0 %2124 }
0x1762   :  { %v2129_v14 = vmul.f32 0.03125, %v2125_v36 }
0x1764   :  { %v2131_v39 = vadd.f32 1e-05, %v2129_v14 }
0x1765   :  { %v2128_v57 = vpop.xlane.xlu0 %2127 }
0x1766   :  { %3254 = vrsqrt.f32 %v2131_v39  ;;  %v2130_v5 = vmul.f32 0.03125, %v2128_v57 }
0x1768   :  { %v2132_v60 = vadd.f32 1e-05, %v2130_v5 }
0x1769   :  { %v2143_v13 = vpop.permute.xlu0 %2142 }
0x176a   :  { %3256 = vrsqrt.f32 %v2132_v60 }
0x176d   :  { %v2239_v42 = vpop.permute.xlu0 %2238 }
0x1770   :  { %v3255_v32 = vpop.eup %3254 }
0x1771   :  { %v2135_v45 = vmul.f32 %v3255_v32, %v2119_v8 }
0x1773   :  { %v2140_v17 = vmul.f32 %v2138_v38, %v2135_v45 }
0x1774   :  { %v3257_v18 = vpop.eup %3256 }
0x1775   :  { %v2136_v31 = vmul.f32 %v3257_v18, %v2120_v29  ;;  %v2145_v37 = vadd.f32 %v2143_v13, %v2140_v17 }
0x1777   :  { %v2141_v55 = vmul.f32 %v2138_v38, %v2136_v31  ;;  %2834 = vmatprep.mubr.msk.f32.mxu1 %vm130_vm0, %v2145_v37 }
0x1779   :  { %v2146_v21 = vadd.f32 %v2143_v13, %v2141_v55 }
0x177b   :  { %2835 = vmatmul.mubr.msk.f32.vlgmr.msra.gmra.mrb[12].mxu1 %vm130_vm0, %v2146_v21 }
0x177c   :  { %2841 = vmatprep.mubr.msk.f32.mxu1 %vm3345_vm4, %v3346_v24 }
0x184e   :  { %v2836_v41 = vpop.f32.mrb[12].mxu1 }
0x184f   :  { %v2237_v1 = vmul.f32 %v2836_v41, %v2233_v35  ;;  %v2219_v4 = vpop.f32.mrb[13].mxu1 }
0x1850   :  { %v2236_v59 = vmul.f32 %v2231_v33, %v2219_v4 }
0x1852   :  { %v3064_v15 = vpack.c.bf16 %v2237_v1, %v2236_v59 }
0x1854   :  { %3065 = vmatpush3.bf16.msra.mxu1 %v3064_v15 }
0x1855   :  { %3066 = vmatprep.subr.bf16.mxu1 %v3344_v22 }
0x1857   :  { %2842 = vmatmul.mubr.msk.f32.vlgmr.msra.gmra.mrb[14].mxu1 %vm431_vm2, %v2239_v42 }
0x1858   :  { %3068 = vmatpush3.bf16.msra.mxu1 %v3067_v54  ;;  %2860 = vmatprep.mubr.msk.f32.mxu1 %vm3345_vm4, %v3346_v24 }
0x1859   :  { %3069 = vmatprep.subr.bf16.mxu1 %v3344_v22 }
0x185c   :  { %3071 = vmatpush3.bf16.msra.mxu1 %v3070_v49 }
0x185d   :  { %3072 = vmatprep.subr.bf16.mxu1 %v3344_v22 }
0x1860   :  { %3074 = vmatpush3.bf16.msra.mxu1 %v3073_v20 }
0x1861   :  { %3075 = vmatprep.subr.bf16.mxu1 %v3344_v22 }
0x1864   :  { %3077 = vmatpush3.bf16.msra.mxu1 %v3076_v46 }
0x192a   :  { %v2308_v47 = vpop.f32.mrb[14].mxu1 }
0x192b   :  { %v2843_v50 = vpop.f32.mrb[15].mxu1  ;;  %2861 = vmatmul.mubr.msk.f32.vlgmr.msra.gmra.mrb[16].mxu1 %vm257_vm1, %v2308_v47 }
0x19fe   :  { %v2385_v7 = vpop.f32.mrb[16].mxu1 }
0x19ff   :  { %v2386_v62 = vadd.f32 %v2438_v51, %v2385_v7  ;;  %v2862_v44 = vpop.f32.mrb[17].mxu1 }
0x1a01   :  { %2389 = vst [vmem:[%s3917_s5] sm:$0xff] %v2386_v62 }
0x1a02   :  { %2394 = vsyncpa [#allocation3], 1 }
0x1a03   :  { %2395 = vsyncpa [#allocation5], 1 }

</bundles_post_ra>
